<compile_context>
chip_gen: v6e
topology: v6e:2x2x1
jax: 0.10.0
libtpu: 0.0.40
codegen_flags: <defaults>
</compile_context>

<pallas_src>
import math
import functools

import jax
import jax.numpy as jnp
import numpy as np
from jax import lax
from jax.experimental import pallas as pl
from jax.experimental.pallas import tpu as pltpu


# --------------------- kernel A: QKV proj + LN + RoPE ---------------------- #
def _qkv_norm_rope_kernel(x_ref, wq_ref, wk_ref, wv_ref,
                          qg_ref, qb_ref, kg_ref, kb_ref,
                          sin_ref, cos_ref,
                          q_out_ref, k_out_ref, v_out_ref,
                          q_acc, k_acc, v_acc,
                          *, n_heads, head_dim):
    kk = pl.program_id(2)               # reduction step over the input dim D
    nk = pl.num_programs(2)

    @pl.when(kk == 0)
    def _init():
        q_acc[...] = jnp.zeros_like(q_acc)
        k_acc[...] = jnp.zeros_like(k_acc)
        v_acc[...] = jnp.zeros_like(v_acc)

    x = x_ref[0]                        # (ts, tkp) bf16
    q_acc[...] += jnp.dot(x, wq_ref[...], preferred_element_type=jnp.float32)
    k_acc[...] += jnp.dot(x, wk_ref[...], preferred_element_type=jnp.float32)
    v_acc[...] += jnp.dot(x, wv_ref[...], preferred_element_type=jnp.float32)

    @pl.when(kk == nk - 1)
    def _finish():
        def layernorm(y, g, b):
            mu = jnp.mean(y, axis=-1, keepdims=True)
            var = jnp.mean(y * y, axis=-1, keepdims=True) - mu * mu  # one pass
            return (y - mu) * lax.rsqrt(var + 1e-5) * g + b

        q = layernorm(q_acc[...], qg_ref[...], qb_ref[...])   # (ts, D) f32
        k = layernorm(k_acc[...], kg_ref[...], kb_ref[...])
        v = v_acc[...]

        sin = sin_ref[...]              # (ts, hd) f32, rotate_half sign baked in
        cos = cos_ref[...]
        half = head_dim // 2

        def rope(t):                    # t: (ts, hd) f32
            if head_dim % 128 == 0:
                # lane-aligned head_dim: XLU rotate (off the VALU critical path)
                rot = pltpu.roll(t, shift=half, axis=1)
            else:
                # small / unaligned head_dim fallback (demo shapes)
                rot = jnp.concatenate([t[:, half:], t[:, :half]], axis=-1)
            return t * cos + rot * sin

        # static head loop; each head's result is stored immediately into its
        # (H, ts, hd) output slot -> no concatenate, no long live ranges.
        for h in range(n_heads):
            sl = slice(h * head_dim, (h + 1) * head_dim)
            q_out_ref[0, h] = rope(q[:, sl]).astype(jnp.bfloat16)
            k_out_ref[0, h] = rope(k[:, sl]).astype(jnp.bfloat16)
            v_out_ref[0, h] = v[:, sl].astype(jnp.bfloat16)


# ------------- kernel B: flash attention + fused output proj --------------- #
def _flash_attn_oproj_kernel(q_ref, k_ref, v_ref, wo_ref, o_ref,
                             m_sc, l_sc, acc_sc, *, scale):
    h = pl.program_id(2)
    kv = pl.program_id(3)
    n_kv = pl.num_programs(3)

    @pl.when(kv == 0)
    def _init():
        m_sc[...] = jnp.full_like(m_sc, -jnp.inf)
        l_sc[...] = jnp.zeros_like(l_sc)
        acc_sc[...] = jnp.zeros_like(acc_sc)

    q = q_ref[0, 0]                     # (tq, hd) bf16
    k = k_ref[0, 0]                     # (tk, hd) bf16
    v = v_ref[0, 0]                     # (tk, hd) bf16

    # scores for this (q-tile, kv-tile): contract head_dim, f32 accumulation
    s = lax.dot_general(q, k, (((1,), (1,)), ((), ())),
                        preferred_element_type=jnp.float32) * scale   # (tq, tk)

    m_prev = m_sc[...]
    m_new = jnp.maximum(m_prev, jnp.max(s, axis=-1, keepdims=True))
    alpha = jnp.exp(m_prev - m_new)
    p = jnp.exp(s - m_new)
    l_sc[...] = alpha * l_sc[...] + jnp.sum(p, axis=-1, keepdims=True)
    acc_sc[...] = alpha * acc_sc[...] + jnp.dot(
        p.astype(v.dtype), v, preferred_element_type=jnp.float32)
    m_sc[...] = m_new

    @pl.when(kv == n_kv - 1)
    def _finish():
        # single normalization per query row, on the EUP (off the VALU path)
        inv_l = pl.reciprocal(l_sc[...], approx=True)
        head_out = (acc_sc[...] * inv_l).astype(jnp.bfloat16)        # (tq, hd)
        contrib = jnp.dot(head_out, wo_ref[0],
                          preferred_element_type=jnp.float32)        # (tq, D)

        @pl.when(h == 0)
        def _first():
            o_ref[0] = contrib

        @pl.when(h > 0)
        def _rest():
            o_ref[0] = o_ref[0] + contrib


# ------------------------------- wrapper ----------------------------------- #
def _tile(n, preferred):
    if n <= preferred:
        return n
    t = preferred
    while t > 1 and n % t != 0:
        t //= 2
    return max(t, 1)


def _bytes(shape, dtype):
    return int(np.prod(shape)) * jnp.dtype(dtype).itemsize


def attention_forward(x, params, sin, cos, *, n_heads):
    B, S, D = x.shape
    head_dim = D // n_heads
    wq_t, wk_t, wv_t, wo_t, qg, qb, kg, kb = params

    # bf16 operands for every MXU matmul (f32 accumulation inside the kernels)
    x_b = x.astype(jnp.bfloat16)
    wq_b = wq_t.astype(jnp.bfloat16)
    wk_b = wk_t.astype(jnp.bfloat16)
    wv_b = wv_t.astype(jnp.bfloat16)
    wo_heads = wo_t.reshape(n_heads, head_dim, D).astype(jnp.bfloat16)

    # fold the rotate_half sign into sin:  rope(t) = t*cos + roll(t, hd/2)*sin_signed
    half = head_dim // 2
    sin_signed = jnp.concatenate([-sin[:, :half], sin[:, half:]], axis=-1)
    sin_signed = sin_signed.astype(jnp.float32)
    cos_f = cos.astype(jnp.float32)

    # ---- tiling (256-aligned at real sizes; clamps to full extent here) ----
    ts = _tile(S, 256)       # kernel A seq tile
    tkp = _tile(D, 512)      # kernel A reduction tile over the input feature dim
    tq = _tile(S, 256)       # kernel B query tile
    tk = _tile(S, 256)       # kernel B key/value tile
    # TODO(synk): ragged / non-power-of-two sequence lengths need masked tail tiles.

    # ----------------- kernel A: QKV projection + LN + RoPE ----------------- #
    kernel_a = functools.partial(_qkv_norm_rope_kernel,
                                 n_heads=n_heads, head_dim=head_dim)
    qkv_shape = jax.ShapeDtypeStruct((B, n_heads, S, head_dim), jnp.bfloat16)

    a_blocks = (2 * (_bytes((ts, tkp), jnp.bfloat16)
                     + 3 * _bytes((tkp, D), jnp.bfloat16)
                     + 3 * _bytes((n_heads, ts, head_dim), jnp.bfloat16)
                     + 2 * _bytes((ts, head_dim), jnp.float32)
                     + 4 * _bytes((1, D), jnp.float32))
                + 3 * _bytes((ts, D), jnp.float32))
    a_vmem = int(min(max(2 * a_blocks, 32 * 1024 * 1024), 64 * 1024 * 1024))

    q_hsd, k_hsd, v_hsd = pl.pallas_call(
        kernel_a,
        out_shape=(qkv_shape, qkv_shape, qkv_shape),
        grid_spec=pltpu.PrefetchScalarGridSpec(
            num_scalar_prefetch=0,
            grid=(B, S // ts, D // tkp),
            in_specs=[
                pl.BlockSpec((1, ts, tkp), lambda b, s, kk: (b, s, kk)),   # x
                pl.BlockSpec((tkp, D), lambda b, s, kk: (kk, 0)),          # wq^T
                pl.BlockSpec((tkp, D), lambda b, s, kk: (kk, 0)),          # wk^T
                pl.BlockSpec((tkp, D), lambda b, s, kk: (kk, 0)),          # wv^T
                pl.BlockSpec((1, D), lambda b, s, kk: (0, 0)),             # q gamma
                pl.BlockSpec((1, D), lambda b, s, kk: (0, 0)),             # q beta
                pl.BlockSpec((1, D), lambda b, s, kk: (0, 0)),             # k gamma
                pl.BlockSpec((1, D), lambda b, s, kk: (0, 0)),             # k beta
                pl.BlockSpec((ts, head_dim), lambda b, s, kk: (s, 0)),     # sin (signed)
                pl.BlockSpec((ts, head_dim), lambda b, s, kk: (s, 0)),     # cos
            ],
            out_specs=(
                pl.BlockSpec((1, n_heads, ts, head_dim),
                             lambda b, s, kk: (b, 0, s, 0)),
                pl.BlockSpec((1, n_heads, ts, head_dim),
                             lambda b, s, kk: (b, 0, s, 0)),
                pl.BlockSpec((1, n_heads, ts, head_dim),
                             lambda b, s, kk: (b, 0, s, 0)),
            ),
            scratch_shapes=[pltpu.VMEM((ts, D), jnp.float32)] * 3,
        ),
        compiler_params=pltpu.CompilerParams(
            dimension_semantics=("parallel", "parallel", "arbitrary"),
            vmem_limit_bytes=a_vmem),
    )(x_b, wq_b, wk_b, wv_b, qg, qb, kg, kb, sin_signed, cos_f)

    # ------------- kernel B: flash attention + output projection ------------ #
    kernel_b = functools.partial(_flash_attn_oproj_kernel,
                                 scale=1.0 / math.sqrt(head_dim))

    b_blocks = (2 * (_bytes((tq, head_dim), jnp.bfloat16)
                     + 2 * _bytes((tk, head_dim), jnp.bfloat16)
                     + _bytes((head_dim, D), jnp.bfloat16)
                     + _bytes((tq, D), jnp.float32))
                + _bytes((tq, head_dim), jnp.float32)
                + 2 * _bytes((tq, 1), jnp.float32))
    b_vmem = int(min(max(2 * b_blocks, 32 * 1024 * 1024), 64 * 1024 * 1024))

    out = pl.pallas_call(
        kernel_b,
        out_shape=jax.ShapeDtypeStruct((B, S, D), jnp.float32),
        grid_spec=pltpu.PrefetchScalarGridSpec(
            num_scalar_prefetch=0,
            grid=(B, S // tq, n_heads, S // tk),
            in_specs=[
                pl.BlockSpec((1, 1, tq, head_dim),
                             lambda b, qi, h, kv: (b, h, qi, 0)),          # q
                pl.BlockSpec((1, 1, tk, head_dim),
                             lambda b, qi, h, kv: (b, h, kv, 0)),          # k
                pl.BlockSpec((1, 1, tk, head_dim),
                             lambda b, qi, h, kv: (b, h, kv, 0)),          # v
                pl.BlockSpec((1, head_dim, D),
                             lambda b, qi, h, kv: (h, 0, 0)),              # wo[h]
            ],
            out_specs=pl.BlockSpec((1, tq, D), lambda b, qi, h, kv: (b, qi, 0)),
            scratch_shapes=[
                pltpu.VMEM((tq, 1), jnp.float32),          # running max
                pltpu.VMEM((tq, 1), jnp.float32),          # running sum
                pltpu.VMEM((tq, head_dim), jnp.float32),   # attention accumulator
            ],
        ),
        compiler_params=pltpu.CompilerParams(
            dimension_semantics=("parallel", "parallel", "arbitrary", "arbitrary"),
            vmem_limit_bytes=b_vmem),
    )(q_hsd, k_hsd, v_hsd, wo_heads)
    return out


# -------------------------- pure-JAX reference ----------------------------- #
# Mirrors the PyTorch module's math in f32 except that (like the kernel) every
# matmul takes bf16 operands with f32 accumulation.
def attention_reference(x, params, sin, cos, *, n_heads):
    B, S, D = x.shape
    hd = D // n_heads
    wq_t, wk_t, wv_t, wo_t, qg, qb, kg, kb = params

    xb = x.astype(jnp.bfloat16)
    wqb, wkb, wvb, wob = (w.astype(jnp.bfloat16)
                          for w in (wq_t, wk_t, wv_t, wo_t))

    q = jnp.dot(xb, wqb, preferred_element_type=jnp.float32)
    k = jnp.dot(xb, wkb, preferred_element_type=jnp.float32)
    v = jnp.dot(xb, wvb, preferred_element_type=jnp.float32)

    def layernorm(y, g, b):
        mu = jnp.mean(y, axis=-1, keepdims=True)
        var = jnp.mean((y - mu) ** 2, axis=-1, keepdims=True)
        return (y - mu) / jnp.sqrt(var + 1e-5) * g + b

    q = layernorm(q, qg, qb)
    k = layernorm(k, kg, kb)

    q = q.reshape(B, S, n_heads, hd)
    k = k.reshape(B, S, n_heads, hd)
    v = v.reshape(B, S, n_heads, hd)

    sin_b = sin[None, :, None, :]
    cos_b = cos[None, :, None, :]

    def rotate_half(t):
        t1, t2 = jnp.split(t, 2, axis=-1)
        return jnp.concatenate([-t2, t1], axis=-1)

    q = q * cos_b + rotate_half(q) * sin_b
    k = k * cos_b + rotate_half(k) * sin_b

    q = q.astype(jnp.bfloat16)
    k = k.astype(jnp.bfloat16)
    v = v.astype(jnp.bfloat16)

    scale = 1.0 / math.sqrt(hd)
    s = jnp.einsum('bqhd,bkhd->bhqk', q, k,
                   preferred_element_type=jnp.float32) * scale
    p = jax.nn.softmax(s, axis=-1)                             # f32
    attn = jnp.einsum('bhqk,bkhd->bqhd', p.astype(jnp.bfloat16), v,
                      preferred_element_type=jnp.float32)
    attn = attn.astype(jnp.bfloat16).reshape(B, S, D)
    return jnp.dot(attn, wob, preferred_element_type=jnp.float32)


# ------------------------- rotary table (precompute) ----------------------- #
def precompute_sin_cos(head_dim, seq_len, theta=10000.0):
    # Same math as Attention.precompute_sin_cos, tiled to full head_dim so it
    # matches the rotate_half convention used in __apply_rotary_emb.
    inv_freq = 1.0 / theta ** (jnp.arange(0, head_dim, 2, dtype=jnp.float32) / head_dim)
    positions = jnp.arange(seq_len, dtype=jnp.float32)
    sinusoid = jnp.einsum('i,j->ij', positions, inv_freq)      # (S, head_dim//2)
    sin = jnp.concatenate([jnp.sin(sinusoid), jnp.sin(sinusoid)], axis=-1)
    cos = jnp.concatenate([jnp.cos(sinusoid), jnp.cos(sinusoid)], axis=-1)
    return sin, cos                                            # (S, head_dim) each


# ---------------------------------- main ----------------------------------- #
if __name__ == "__main__":
    B, S, DIM, N_HEADS = 2, 8, 32, 4
    HEAD_DIM = DIM // N_HEADS

    key = jax.random.PRNGKey(0)
    k_x, k_q, k_k, k_v, k_o = jax.random.split(key, 5)

    x = jax.random.normal(k_x, (B, S, DIM), dtype=jnp.float32)

    # Deterministic parameter init (nn.Linear-like scale, bias=False), weights
    # passed PRE-TRANSPOSED as (in_dim, out_dim).
    wscale = 1.0 / math.sqrt(DIM)
    wq_t = jax.random.uniform(k_q, (DIM, DIM), jnp.float32, -wscale, wscale)
    wk_t = jax.random.uniform(k_k, (DIM, DIM), jnp.float32, -wscale, wscale)
    wv_t = jax.random.uniform(k_v, (DIM, DIM), jnp.float32, -wscale, wscale)
    wo_t = jax.random.uniform(k_o, (DIM, DIM), jnp.float32, -wscale, wscale)
    qg = jnp.ones((1, DIM), jnp.float32)
    qb = jnp.zeros((1, DIM), jnp.float32)
    kg = jnp.ones((1, DIM), jnp.float32)
    kb = jnp.zeros((1, DIM), jnp.float32)

    params = (wq_t, wk_t, wv_t, wo_t, qg, qb, kg, kb)
    sin, cos = precompute_sin_cos(HEAD_DIM, S)

    out = attention_forward(x, params, sin, cos, n_heads=N_HEADS)
    out = jax.block_until_ready(out)

    ref = attention_reference(x, params, sin, cos, n_heads=N_HEADS)
    # tolerance sized for bf16 matmul operands (f32 accumulation / statistics)
    np.testing.assert_allclose(np.asarray(out), np.asarray(ref),
                               rtol=2e-2, atol=2e-2)

    print("KERNEL_OK")
</pallas_src>

<mosaic_0001>
module attributes {stable_mosaic.version = 11 : i64} {
  func.func @_qkv_norm_rope_kernel(%arg0: i32, %arg1: i32, %arg2: i32, %arg3: memref<1x8x32xbf16, #tpu.memory_space<vmem>>, %arg4: memref<32x32xbf16, #tpu.memory_space<vmem>>, %arg5: memref<32x32xbf16, #tpu.memory_space<vmem>>, %arg6: memref<32x32xbf16, #tpu.memory_space<vmem>>, %arg7: memref<1x32xf32, #tpu.memory_space<vmem>>, %arg8: memref<1x32xf32, #tpu.memory_space<vmem>>, %arg9: memref<1x32xf32, #tpu.memory_space<vmem>>, %arg10: memref<1x32xf32, #tpu.memory_space<vmem>>, %arg11: memref<8x8xf32, #tpu.memory_space<vmem>>, %arg12: memref<8x8xf32, #tpu.memory_space<vmem>>, %arg13: memref<1x4x8x8xbf16, #tpu.memory_space<vmem>>, %arg14: memref<1x4x8x8xbf16, #tpu.memory_space<vmem>>, %arg15: memref<1x4x8x8xbf16, #tpu.memory_space<vmem>>, %arg16: memref<8x32xf32, #tpu.memory_space<vmem>>, %arg17: memref<8x32xf32, #tpu.memory_space<vmem>>, %arg18: memref<8x32xf32, #tpu.memory_space<vmem>>) attributes {dimension_semantics = [#tpu.dimension_semantics<parallel>, #tpu.dimension_semantics<parallel>, #tpu.dimension_semantics<arbitrary>], iteration_bounds = array<i64: 2, 1, 1>, scalar_prefetch = 0 : i64, scratch_operands = 3 : i64, tpu.core_type = #tpu.core_type<tc>, window_params = [{transform_indices = @transform_0, window_bounds = array<i64: 1, 8, 32>}, {transform_indices = @transform_1, window_bounds = array<i64: 32, 32>}, {transform_indices = @transform_2, window_bounds = array<i64: 32, 32>}, {transform_indices = @transform_3, window_bounds = array<i64: 32, 32>}, {pipeline_mode = #tpu.pipeline_mode<synchronous>, transform_indices = @transform_4, window_bounds = array<i64: 1, 32>}, {pipeline_mode = #tpu.pipeline_mode<synchronous>, transform_indices = @transform_5, window_bounds = array<i64: 1, 32>}, {pipeline_mode = #tpu.pipeline_mode<synchronous>, transform_indices = @transform_6, window_bounds = array<i64: 1, 32>}, {pipeline_mode = #tpu.pipeline_mode<synchronous>, transform_indices = @transform_7, window_bounds = array<i64: 1, 32>}, {transform_indices = @transform_8, window_bounds = array<i64: 8, 8>}, {transform_indices = @transform_9, window_bounds = array<i64: 8, 8>}, {transform_indices = @transform_10, window_bounds = array<i64: 1, 4, 8, 8>}, {transform_indices = @transform_11, window_bounds = array<i64: 1, 4, 8, 8>}, {transform_indices = @transform_12, window_bounds = array<i64: 1, 4, 8, 8>}]} {
    %c0_i32 = arith.constant 0 : i32
    %0 = arith.cmpi eq, %arg2, %c0_i32 : i32
    %1 = arith.extui %0 : i1 to i32
    %c0_i32_0 = arith.constant 0 : i32
    %2 = arith.cmpi ne, %1, %c0_i32_0 : i32
    scf.if %2 {
      %cst_25 = arith.constant 0.000000e+00 : f32
      %23 = vector.broadcast %cst_25 : f32 to vector<8x32xf32>
      %c0_26 = arith.constant 0 : index
      %c0_27 = arith.constant 0 : index
      %24 = vector.load %arg16[%c0_26, %c0_27] : memref<8x32xf32, #tpu.memory_space<vmem>>, vector<8x32xf32>
      tpu.vector_store %arg16[%c0_26, %c0_27], %23 {strides = array<i32>} : memref<8x32xf32, #tpu.memory_space<vmem>>, vector<8x32xf32>,
      %cst_28 = arith.constant 0.000000e+00 : f32
      %25 = vector.broadcast %cst_28 : f32 to vector<8x32xf32>
      %c0_29 = arith.constant 0 : index
      %c0_30 = arith.constant 0 : index
      %26 = vector.load %arg17[%c0_29, %c0_30] : memref<8x32xf32, #tpu.memory_space<vmem>>, vector<8x32xf32>
      tpu.vector_store %arg17[%c0_29, %c0_30], %25 {strides = array<i32>} : memref<8x32xf32, #tpu.memory_space<vmem>>, vector<8x32xf32>,
      %cst_31 = arith.constant 0.000000e+00 : f32
      %27 = vector.broadcast %cst_31 : f32 to vector<8x32xf32>
      %c0_32 = arith.constant 0 : index
      %c0_33 = arith.constant 0 : index
      %28 = vector.load %arg18[%c0_32, %c0_33] : memref<8x32xf32, #tpu.memory_space<vmem>>, vector<8x32xf32>
      tpu.vector_store %arg18[%c0_32, %c0_33], %27 {strides = array<i32>} : memref<8x32xf32, #tpu.memory_space<vmem>>, vector<8x32xf32>,
    } else {
    }
    %c0 = arith.constant 0 : index
    %c0_1 = arith.constant 0 : index
    %c0_2 = arith.constant 0 : index
    %3 = vector.load %arg3[%c0, %c0_1, %c0_2] : memref<1x8x32xbf16, #tpu.memory_space<vmem>>, vector<1x8x32xbf16>
    %4 = vector.shape_cast %3 : vector<1x8x32xbf16> to vector<8x32xbf16>
    %c0_3 = arith.constant 0 : index
    %c0_4 = arith.constant 0 : index
    %5 = vector.load %arg16[%c0_3, %c0_4] : memref<8x32xf32, #tpu.memory_space<vmem>>, vector<8x32xf32>
    %c0_5 = arith.constant 0 : index
    %c0_6 = arith.constant 0 : index
    %6 = vector.load %arg4[%c0_5, %c0_6] : memref<32x32xbf16, #tpu.memory_space<vmem>>, vector<32x32xbf16>
    %cst = arith.constant dense<0.000000e+00> : vector<8x32xf32>
    %7 = tpu.matmul %4, %6, %cst {dimension_numbers = #tpu.dot_dimension_numbers<[1], [0], [0], [1], [0, 0, 1, 1], [], []>} : vector<8x32xbf16>, vector<32x32xbf16>, vector<8x32xf32> -> vector<8x32xf32>
    %8 = arith.addf %5, %7 : vector<8x32xf32>
    %c0_7 = arith.constant 0 : index
    %c0_8 = arith.constant 0 : index
    %9 = vector.load %arg16[%c0_7, %c0_8] : memref<8x32xf32, #tpu.memory_space<vmem>>, vector<8x32xf32>
    tpu.vector_store %arg16[%c0_7, %c0_8], %8 {strides = array<i32>} : memref<8x32xf32, #tpu.memory_space<vmem>>, vector<8x32xf32>,
    %c0_9 = arith.constant 0 : index
    %c0_10 = arith.constant 0 : index
    %10 = vector.load %arg17[%c0_9, %c0_10] : memref<8x32xf32, #tpu.memory_space<vmem>>, vector<8x32xf32>
    %c0_11 = arith.constant 0 : index
    %c0_12 = arith.constant 0 : index
    %11 = vector.load %arg5[%c0_11, %c0_12] : memref<32x32xbf16, #tpu.memory_space<vmem>>, vector<32x32xbf16>
    %cst_13 = arith.constant dense<0.000000e+00> : vector<8x32xf32>
    %12 = tpu.matmul %4, %11, %cst_13 {dimension_numbers = #tpu.dot_dimension_numbers<[1], [0], [0], [1], [0, 0, 1, 1], [], []>} : vector<8x32xbf16>, vector<32x32xbf16>, vector<8x32xf32> -> vector<8x32xf32>
    %13 = arith.addf %10, %12 : vector<8x32xf32>
    %c0_14 = arith.constant 0 : index
    %c0_15 = arith.constant 0 : index
    %14 = vector.load %arg17[%c0_14, %c0_15] : memref<8x32xf32, #tpu.memory_space<vmem>>, vector<8x32xf32>
    tpu.vector_store %arg17[%c0_14, %c0_15], %13 {strides = array<i32>} : memref<8x32xf32, #tpu.memory_space<vmem>>, vector<8x32xf32>,
    %c0_16 = arith.constant 0 : index
    %c0_17 = arith.constant 0 : index
    %15 = vector.load %arg18[%c0_16, %c0_17] : memref<8x32xf32, #tpu.memory_space<vmem>>, vector<8x32xf32>
    %c0_18 = arith.constant 0 : index
    %c0_19 = arith.constant 0 : index
    %16 = vector.load %arg6[%c0_18, %c0_19] : memref<32x32xbf16, #tpu.memory_space<vmem>>, vector<32x32xbf16>
    %cst_20 = arith.constant dense<0.000000e+00> : vector<8x32xf32>
    %17 = tpu.matmul %4, %16, %cst_20 {dimension_numbers = #tpu.dot_dimension_numbers<[1], [0], [0], [1], [0, 0, 1, 1], [], []>} : vector<8x32xbf16>, vector<32x32xbf16>, vector<8x32xf32> -> vector<8x32xf32>
    %18 = arith.addf %15, %17 : vector<8x32xf32>
    %c0_21 = arith.constant 0 : index
    %c0_22 = arith.constant 0 : index
    %19 = vector.load %arg18[%c0_21, %c0_22] : memref<8x32xf32, #tpu.memory_space<vmem>>, vector<8x32xf32>
    tpu.vector_store %arg18[%c0_21, %c0_22], %18 {strides = array<i32>} : memref<8x32xf32, #tpu.memory_space<vmem>>, vector<8x32xf32>,
    %c0_i32_23 = arith.constant 0 : i32
    %20 = arith.cmpi eq, %arg2, %c0_i32_23 : i32
    %21 = arith.extui %20 : i1 to i32
    %c0_i32_24 = arith.constant 0 : i32
    %22 = arith.cmpi ne, %21, %c0_i32_24 : i32
    scf.if %22 {
      %c0_25 = arith.constant 0 : index
      %c0_26 = arith.constant 0 : index
      %23 = vector.load %arg16[%c0_25, %c0_26] : memref<8x32xf32, #tpu.memory_space<vmem>>, vector<8x32xf32>
      %c0_27 = arith.constant 0 : index
      %c0_28 = arith.constant 0 : index
      %24 = vector.load %arg7[%c0_27, %c0_28] : memref<1x32xf32, #tpu.memory_space<vmem>>, vector<1x32xf32>
      %c0_29 = arith.constant 0 : index
      %c0_30 = arith.constant 0 : index
      %25 = vector.load %arg8[%c0_29, %c0_30] : memref<1x32xf32, #tpu.memory_space<vmem>>, vector<1x32xf32>
      %cst_31 = arith.constant dense<0.000000e+00> : vector<8xf32>
      %26 = vector.multi_reduction <add>, %23, %cst_31 [1] : vector<8x32xf32> to vector<8xf32>
      %27 = vector.shape_cast %26 : vector<8xf32> to vector<8x1xf32>
      %cst_32 = arith.constant 3.200000e+01 : f32
      %28 = vector.broadcast %cst_32 : f32 to vector<8x1xf32>
      %29 = arith.divf %27, %28 : vector<8x1xf32>
      %30 = arith.mulf %23, %23 : vector<8x32xf32>
      %cst_33 = arith.constant dense<0.000000e+00> : vector<8xf32>
      %31 = vector.multi_reduction <add>, %30, %cst_33 [1] : vector<8x32xf32> to vector<8xf32>
      %32 = vector.shape_cast %31 : vector<8xf32> to vector<8x1xf32>
      %cst_34 = arith.constant 3.200000e+01 : f32
      %33 = vector.broadcast %cst_34 : f32 to vector<8x1xf32>
      %34 = arith.divf %32, %33 : vector<8x1xf32>
      %35 = arith.mulf %29, %29 : vector<8x1xf32>
      %36 = arith.subf %34, %35 : vector<8x1xf32>
      %37 = vector.broadcast %29 : vector<8x1xf32> to vector<8x32xf32>
      %38 = arith.subf %23, %37 : vector<8x32xf32>
      %cst_35 = arith.constant 9.99999974E-6 : f32
      %39 = vector.broadcast %cst_35 : f32 to vector<8x1xf32>
      %40 = arith.addf %36, %39 : vector<8x1xf32>
      %41 = math.rsqrt %40 : vector<8x1xf32>
      %42 = vector.broadcast %41 : vector<8x1xf32> to vector<8x32xf32>
      %43 = arith.mulf %38, %42 : vector<8x32xf32>
      %44 = vector.broadcast %24 : vector<1x32xf32> to vector<8x32xf32>
      %45 = arith.mulf %43, %44 : vector<8x32xf32>
      %46 = vector.broadcast %25 : vector<1x32xf32> to vector<8x32xf32>
      %47 = arith.addf %45, %46 : vector<8x32xf32>
      %c0_36 = arith.constant 0 : index
      %c0_37 = arith.constant 0 : index
      %48 = vector.load %arg17[%c0_36, %c0_37] : memref<8x32xf32, #tpu.memory_space<vmem>>, vector<8x32xf32>
      %c0_38 = arith.constant 0 : index
      %c0_39 = arith.constant 0 : index
      %49 = vector.load %arg9[%c0_38, %c0_39] : memref<1x32xf32, #tpu.memory_space<vmem>>, vector<1x32xf32>
      %c0_40 = arith.constant 0 : index
      %c0_41 = arith.constant 0 : index
      %50 = vector.load %arg10[%c0_40, %c0_41] : memref<1x32xf32, #tpu.memory_space<vmem>>, vector<1x32xf32>
      %cst_42 = arith.constant dense<0.000000e+00> : vector<8xf32>
      %51 = vector.multi_reduction <add>, %48, %cst_42 [1] : vector<8x32xf32> to vector<8xf32>
      %52 = vector.shape_cast %51 : vector<8xf32> to vector<8x1xf32>
      %cst_43 = arith.constant 3.200000e+01 : f32
      %53 = vector.broadcast %cst_43 : f32 to vector<8x1xf32>
      %54 = arith.divf %52, %53 : vector<8x1xf32>
      %55 = arith.mulf %48, %48 : vector<8x32xf32>
      %cst_44 = arith.constant dense<0.000000e+00> : vector<8xf32>
      %56 = vector.multi_reduction <add>, %55, %cst_44 [1] : vector<8x32xf32> to vector<8xf32>
      %57 = vector.shape_cast %56 : vector<8xf32> to vector<8x1xf32>
      %cst_45 = arith.constant 3.200000e+01 : f32
      %58 = vector.broadcast %cst_45 : f32 to vector<8x1xf32>
      %59 = arith.divf %57, %58 : vector<8x1xf32>
      %60 = arith.mulf %54, %54 : vector<8x1xf32>
      %61 = arith.subf %59, %60 : vector<8x1xf32>
      %62 = vector.broadcast %54 : vector<8x1xf32> to vector<8x32xf32>
      %63 = arith.subf %48, %62 : vector<8x32xf32>
      %cst_46 = arith.constant 9.99999974E-6 : f32
      %64 = vector.broadcast %cst_46 : f32 to vector<8x1xf32>
      %65 = arith.addf %61, %64 : vector<8x1xf32>
      %66 = math.rsqrt %65 : vector<8x1xf32>
      %67 = vector.broadcast %66 : vector<8x1xf32> to vector<8x32xf32>
      %68 = arith.mulf %63, %67 : vector<8x32xf32>
      %69 = vector.broadcast %49 : vector<1x32xf32> to vector<8x32xf32>
      %70 = arith.mulf %68, %69 : vector<8x32xf32>
      %71 = vector.broadcast %50 : vector<1x32xf32> to vector<8x32xf32>
      %72 = arith.addf %70, %71 : vector<8x32xf32>
      %c0_47 = arith.constant 0 : index
      %c0_48 = arith.constant 0 : index
      %73 = vector.load %arg18[%c0_47, %c0_48] : memref<8x32xf32, #tpu.memory_space<vmem>>, vector<8x32xf32>
      %c0_49 = arith.constant 0 : index
      %c0_50 = arith.constant 0 : index
      %74 = vector.load %arg11[%c0_49, %c0_50] : memref<8x8xf32, #tpu.memory_space<vmem>>, vector<8x8xf32>
      %c0_51 = arith.constant 0 : index
      %c0_52 = arith.constant 0 : index
      %75 = vector.load %arg12[%c0_51, %c0_52] : memref<8x8xf32, #tpu.memory_space<vmem>>, vector<8x8xf32>
      %76 = vector.extract_strided_slice %47 {offsets = [0, 0], sizes = [8, 8], strides = [1, 1]} : vector<8x32xf32> to vector<8x8xf32>
      %77 = vector.extract_strided_slice %76 {offsets = [0, 4], sizes = [8, 4], strides = [1, 1]} : vector<8x8xf32> to vector<8x4xf32>
      %78 = vector.extract_strided_slice %76 {offsets = [0, 0], sizes = [8, 4], strides = [1, 1]} : vector<8x8xf32> to vector<8x4xf32>
      %79 = tpu.concatenate %77, %78 in 1 : vector<8x4xf32>, vector<8x4xf32> -> vector<8x8xf32>
      %80 = arith.mulf %76, %75 : vector<8x8xf32>
      %81 = arith.mulf %79, %74 : vector<8x8xf32>
      %82 = arith.addf %80, %81 : vector<8x8xf32>
      %83 = arith.truncf %82 : vector<8x8xf32> to vector<8x8xbf16>
      %c0_53 = arith.constant 0 : index
      %c0_54 = arith.constant 0 : index
      %c0_55 = arith.constant 0 : index
      %c0_56 = arith.constant 0 : index
      %84 = vector.load %arg13[%c0_53, %c0_54, %c0_55, %c0_56] : memref<1x4x8x8xbf16, #tpu.memory_space<vmem>>, vector<1x1x8x8xbf16>
      %85 = vector.shape_cast %84 : vector<1x1x8x8xbf16> to vector<8x8xbf16>
      %86 = vector.shape_cast %83 : vector<8x8xbf16> to vector<1x1x8x8xbf16>
      tpu.vector_store %arg13[%c0_53, %c0_54, %c0_55, %c0_56], %86 {strides = array<i32>} : memref<1x4x8x8xbf16, #tpu.memory_space<vmem>>, vector<1x1x8x8xbf16>,
      %87 = vector.extract_strided_slice %72 {offsets = [0, 0], sizes = [8, 8], strides = [1, 1]} : vector<8x32xf32> to vector<8x8xf32>
      %88 = vector.extract_strided_slice %87 {offsets = [0, 4], sizes = [8, 4], strides = [1, 1]} : vector<8x8xf32> to vector<8x4xf32>
      %89 = vector.extract_strided_slice %87 {offsets = [0, 0], sizes = [8, 4], strides = [1, 1]} : vector<8x8xf32> to vector<8x4xf32>
      %90 = tpu.concatenate %88, %89 in 1 : vector<8x4xf32>, vector<8x4xf32> -> vector<8x8xf32>
      %91 = arith.mulf %87, %75 : vector<8x8xf32>
      %92 = arith.mulf %90, %74 : vector<8x8xf32>
      %93 = arith.addf %91, %92 : vector<8x8xf32>
      %94 = arith.truncf %93 : vector<8x8xf32> to vector<8x8xbf16>
      %c0_57 = arith.constant 0 : index
      %c0_58 = arith.constant 0 : index
      %c0_59 = arith.constant 0 : index
      %c0_60 = arith.constant 0 : index
      %95 = vector.load %arg14[%c0_57, %c0_58, %c0_59, %c0_60] : memref<1x4x8x8xbf16, #tpu.memory_space<vmem>>, vector<1x1x8x8xbf16>
      %96 = vector.shape_cast %95 : vector<1x1x8x8xbf16> to vector<8x8xbf16>
      %97 = vector.shape_cast %94 : vector<8x8xbf16> to vector<1x1x8x8xbf16>
      tpu.vector_store %arg14[%c0_57, %c0_58, %c0_59, %c0_60], %97 {strides = array<i32>} : memref<1x4x8x8xbf16, #tpu.memory_space<vmem>>, vector<1x1x8x8xbf16>,
      %98 = vector.extract_strided_slice %73 {offsets = [0, 0], sizes = [8, 8], strides = [1, 1]} : vector<8x32xf32> to vector<8x8xf32>
      %99 = arith.truncf %98 : vector<8x8xf32> to vector<8x8xbf16>
      %c0_61 = arith.constant 0 : index
      %c0_62 = arith.constant 0 : index
      %c0_63 = arith.constant 0 : index
      %c0_64 = arith.constant 0 : index
      %100 = vector.load %arg15[%c0_61, %c0_62, %c0_63, %c0_64] : memref<1x4x8x8xbf16, #tpu.memory_space<vmem>>, vector<1x1x8x8xbf16>
      %101 = vector.shape_cast %100 : vector<1x1x8x8xbf16> to vector<8x8xbf16>
      %102 = vector.shape_cast %99 : vector<8x8xbf16> to vector<1x1x8x8xbf16>
      tpu.vector_store %arg15[%c0_61, %c0_62, %c0_63, %c0_64], %102 {strides = array<i32>} : memref<1x4x8x8xbf16, #tpu.memory_space<vmem>>, vector<1x1x8x8xbf16>,
      %103 = vector.extract_strided_slice %47 {offsets = [0, 8], sizes = [8, 8], strides = [1, 1]} : vector<8x32xf32> to vector<8x8xf32>
      %104 = vector.extract_strided_slice %103 {offsets = [0, 4], sizes = [8, 4], strides = [1, 1]} : vector<8x8xf32> to vector<8x4xf32>
      %105 = vector.extract_strided_slice %103 {offsets = [0, 0], sizes = [8, 4], strides = [1, 1]} : vector<8x8xf32> to vector<8x4xf32>
      %106 = tpu.concatenate %104, %105 in 1 : vector<8x4xf32>, vector<8x4xf32> -> vector<8x8xf32>
      %107 = arith.mulf %103, %75 : vector<8x8xf32>
      %108 = arith.mulf %106, %74 : vector<8x8xf32>
      %109 = arith.addf %107, %108 : vector<8x8xf32>
      %110 = arith.truncf %109 : vector<8x8xf32> to vector<8x8xbf16>
      %c0_65 = arith.constant 0 : index
      %c1 = arith.constant 1 : index
      %c0_66 = arith.constant 0 : index
      %c0_67 = arith.constant 0 : index
      %111 = vector.load %arg13[%c0_65, %c1, %c0_66, %c0_67] : memref<1x4x8x8xbf16, #tpu.memory_space<vmem>>, vector<1x1x8x8xbf16>
      %112 = vector.shape_cast %111 : vector<1x1x8x8xbf16> to vector<8x8xbf16>
      %113 = vector.shape_cast %110 : vector<8x8xbf16> to vector<1x1x8x8xbf16>
      tpu.vector_store %arg13[%c0_65, %c1, %c0_66, %c0_67], %113 {strides = array<i32>} : memref<1x4x8x8xbf16, #tpu.memory_space<vmem>>, vector<1x1x8x8xbf16>,
      %114 = vector.extract_strided_slice %72 {offsets = [0, 8], sizes = [8, 8], strides = [1, 1]} : vector<8x32xf32> to vector<8x8xf32>
      %115 = vector.extract_strided_slice %114 {offsets = [0, 4], sizes = [8, 4], strides = [1, 1]} : vector<8x8xf32> to vector<8x4xf32>
      %116 = vector.extract_strided_slice %114 {offsets = [0, 0], sizes = [8, 4], strides = [1, 1]} : vector<8x8xf32> to vector<8x4xf32>
      %117 = tpu.concatenate %115, %116 in 1 : vector<8x4xf32>, vector<8x4xf32> -> vector<8x8xf32>
      %118 = arith.mulf %114, %75 : vector<8x8xf32>
      %119 = arith.mulf %117, %74 : vector<8x8xf32>
      %120 = arith.addf %118, %119 : vector<8x8xf32>
      %121 = arith.truncf %120 : vector<8x8xf32> to vector<8x8xbf16>
      %c0_68 = arith.constant 0 : index
      %c1_69 = arith.constant 1 : index
      %c0_70 = arith.constant 0 : index
      %c0_71 = arith.constant 0 : index
      %122 = vector.load %arg14[%c0_68, %c1_69, %c0_70, %c0_71] : memref<1x4x8x8xbf16, #tpu.memory_space<vmem>>, vector<1x1x8x8xbf16>
      %123 = vector.shape_cast %122 : vector<1x1x8x8xbf16> to vector<8x8xbf16>
      %124 = vector.shape_cast %121 : vector<8x8xbf16> to vector<1x1x8x8xbf16>
      tpu.vector_store %arg14[%c0_68, %c1_69, %c0_70, %c0_71], %124 {strides = array<i32>} : memref<1x4x8x8xbf16, #tpu.memory_space<vmem>>, vector<1x1x8x8xbf16>,
      %125 = vector.extract_strided_slice %73 {offsets = [0, 8], sizes = [8, 8], strides = [1, 1]} : vector<8x32xf32> to vector<8x8xf32>
      %126 = arith.truncf %125 : vector<8x8xf32> to vector<8x8xbf16>
      %c0_72 = arith.constant 0 : index
      %c1_73 = arith.constant 1 : index
      %c0_74 = arith.constant 0 : index
      %c0_75 = arith.constant 0 : index
      %127 = vector.load %arg15[%c0_72, %c1_73, %c0_74, %c0_75] : memref<1x4x8x8xbf16, #tpu.memory_space<vmem>>, vector<1x1x8x8xbf16>
      %128 = vector.shape_cast %127 : vector<1x1x8x8xbf16> to vector<8x8xbf16>
      %129 = vector.shape_cast %126 : vector<8x8xbf16> to vector<1x1x8x8xbf16>
      tpu.vector_store %arg15[%c0_72, %c1_73, %c0_74, %c0_75], %129 {strides = array<i32>} : memref<1x4x8x8xbf16, #tpu.memory_space<vmem>>, vector<1x1x8x8xbf16>,
      %130 = vector.extract_strided_slice %47 {offsets = [0, 16], sizes = [8, 8], strides = [1, 1]} : vector<8x32xf32> to vector<8x8xf32>
      %131 = vector.extract_strided_slice %130 {offsets = [0, 4], sizes = [8, 4], strides = [1, 1]} : vector<8x8xf32> to vector<8x4xf32>
      %132 = vector.extract_strided_slice %130 {offsets = [0, 0], sizes = [8, 4], strides = [1, 1]} : vector<8x8xf32> to vector<8x4xf32>
      %133 = tpu.concatenate %131, %132 in 1 : vector<8x4xf32>, vector<8x4xf32> -> vector<8x8xf32>
      %134 = arith.mulf %130, %75 : vector<8x8xf32>
      %135 = arith.mulf %133, %74 : vector<8x8xf32>
      %136 = arith.addf %134, %135 : vector<8x8xf32>
      %137 = arith.truncf %136 : vector<8x8xf32> to vector<8x8xbf16>
      %c0_76 = arith.constant 0 : index
      %c2 = arith.constant 2 : index
      %c0_77 = arith.constant 0 : index
      %c0_78 = arith.constant 0 : index
      %138 = vector.load %arg13[%c0_76, %c2, %c0_77, %c0_78] : memref<1x4x8x8xbf16, #tpu.memory_space<vmem>>, vector<1x1x8x8xbf16>
      %139 = vector.shape_cast %138 : vector<1x1x8x8xbf16> to vector<8x8xbf16>
      %140 = vector.shape_cast %137 : vector<8x8xbf16> to vector<1x1x8x8xbf16>
      tpu.vector_store %arg13[%c0_76, %c2, %c0_77, %c0_78], %140 {strides = array<i32>} : memref<1x4x8x8xbf16, #tpu.memory_space<vmem>>, vector<1x1x8x8xbf16>,
      %141 = vector.extract_strided_slice %72 {offsets = [0, 16], sizes = [8, 8], strides = [1, 1]} : vector<8x32xf32> to vector<8x8xf32>
      %142 = vector.extract_strided_slice %141 {offsets = [0, 4], sizes = [8, 4], strides = [1, 1]} : vector<8x8xf32> to vector<8x4xf32>
      %143 = vector.extract_strided_slice %141 {offsets = [0, 0], sizes = [8, 4], strides = [1, 1]} : vector<8x8xf32> to vector<8x4xf32>
      %144 = tpu.concatenate %142, %143 in 1 : vector<8x4xf32>, vector<8x4xf32> -> vector<8x8xf32>
      %145 = arith.mulf %141, %75 : vector<8x8xf32>
      %146 = arith.mulf %144, %74 : vector<8x8xf32>
      %147 = arith.addf %145, %146 : vector<8x8xf32>
      %148 = arith.truncf %147 : vector<8x8xf32> to vector<8x8xbf16>
      %c0_79 = arith.constant 0 : index
      %c2_80 = arith.constant 2 : index
      %c0_81 = arith.constant 0 : index
      %c0_82 = arith.constant 0 : index
      %149 = vector.load %arg14[%c0_79, %c2_80, %c0_81, %c0_82] : memref<1x4x8x8xbf16, #tpu.memory_space<vmem>>, vector<1x1x8x8xbf16>
      %150 = vector.shape_cast %149 : vector<1x1x8x8xbf16> to vector<8x8xbf16>
      %151 = vector.shape_cast %148 : vector<8x8xbf16> to vector<1x1x8x8xbf16>
      tpu.vector_store %arg14[%c0_79, %c2_80, %c0_81, %c0_82], %151 {strides = array<i32>} : memref<1x4x8x8xbf16, #tpu.memory_space<vmem>>, vector<1x1x8x8xbf16>,
      %152 = vector.extract_strided_slice %73 {offsets = [0, 16], sizes = [8, 8], strides = [1, 1]} : vector<8x32xf32> to vector<8x8xf32>
      %153 = arith.truncf %152 : vector<8x8xf32> to vector<8x8xbf16>
      %c0_83 = arith.constant 0 : index
      %c2_84 = arith.constant 2 : index
      %c0_85 = arith.constant 0 : index
      %c0_86 = arith.constant 0 : index
      %154 = vector.load %arg15[%c0_83, %c2_84, %c0_85, %c0_86] : memref<1x4x8x8xbf16, #tpu.memory_space<vmem>>, vector<1x1x8x8xbf16>
      %155 = vector.shape_cast %154 : vector<1x1x8x8xbf16> to vector<8x8xbf16>
      %156 = vector.shape_cast %153 : vector<8x8xbf16> to vector<1x1x8x8xbf16>
      tpu.vector_store %arg15[%c0_83, %c2_84, %c0_85, %c0_86], %156 {strides = array<i32>} : memref<1x4x8x8xbf16, #tpu.memory_space<vmem>>, vector<1x1x8x8xbf16>,
      %157 = vector.extract_strided_slice %47 {offsets = [0, 24], sizes = [8, 8], strides = [1, 1]} : vector<8x32xf32> to vector<8x8xf32>
      %158 = vector.extract_strided_slice %157 {offsets = [0, 4], sizes = [8, 4], strides = [1, 1]} : vector<8x8xf32> to vector<8x4xf32>
      %159 = vector.extract_strided_slice %157 {offsets = [0, 0], sizes = [8, 4], strides = [1, 1]} : vector<8x8xf32> to vector<8x4xf32>
      %160 = tpu.concatenate %158, %159 in 1 : vector<8x4xf32>, vector<8x4xf32> -> vector<8x8xf32>
      %161 = arith.mulf %157, %75 : vector<8x8xf32>
      %162 = arith.mulf %160, %74 : vector<8x8xf32>
      %163 = arith.addf %161, %162 : vector<8x8xf32>
      %164 = arith.truncf %163 : vector<8x8xf32> to vector<8x8xbf16>
      %c0_87 = arith.constant 0 : index
      %c3 = arith.constant 3 : index
      %c0_88 = arith.constant 0 : index
      %c0_89 = arith.constant 0 : index
      %165 = vector.load %arg13[%c0_87, %c3, %c0_88, %c0_89] : memref<1x4x8x8xbf16, #tpu.memory_space<vmem>>, vector<1x1x8x8xbf16>
      %166 = vector.shape_cast %165 : vector<1x1x8x8xbf16> to vector<8x8xbf16>
      %167 = vector.shape_cast %164 : vector<8x8xbf16> to vector<1x1x8x8xbf16>
      tpu.vector_store %arg13[%c0_87, %c3, %c0_88, %c0_89], %167 {strides = array<i32>} : memref<1x4x8x8xbf16, #tpu.memory_space<vmem>>, vector<1x1x8x8xbf16>,
      %168 = vector.extract_strided_slice %72 {offsets = [0, 24], sizes = [8, 8], strides = [1, 1]} : vector<8x32xf32> to vector<8x8xf32>
      %169 = vector.extract_strided_slice %168 {offsets = [0, 4], sizes = [8, 4], strides = [1, 1]} : vector<8x8xf32> to vector<8x4xf32>
      %170 = vector.extract_strided_slice %168 {offsets = [0, 0], sizes = [8, 4], strides = [1, 1]} : vector<8x8xf32> to vector<8x4xf32>
      %171 = tpu.concatenate %169, %170 in 1 : vector<8x4xf32>, vector<8x4xf32> -> vector<8x8xf32>
      %172 = arith.mulf %168, %75 : vector<8x8xf32>
      %173 = arith.mulf %171, %74 : vector<8x8xf32>
      %174 = arith.addf %172, %173 : vector<8x8xf32>
      %175 = arith.truncf %174 : vector<8x8xf32> to vector<8x8xbf16>
      %c0_90 = arith.constant 0 : index
      %c3_91 = arith.constant 3 : index
      %c0_92 = arith.constant 0 : index
      %c0_93 = arith.constant 0 : index
      %176 = vector.load %arg14[%c0_90, %c3_91, %c0_92, %c0_93] : memref<1x4x8x8xbf16, #tpu.memory_space<vmem>>, vector<1x1x8x8xbf16>
      %177 = vector.shape_cast %176 : vector<1x1x8x8xbf16> to vector<8x8xbf16>
      %178 = vector.shape_cast %175 : vector<8x8xbf16> to vector<1x1x8x8xbf16>
      tpu.vector_store %arg14[%c0_90, %c3_91, %c0_92, %c0_93], %178 {strides = array<i32>} : memref<1x4x8x8xbf16, #tpu.memory_space<vmem>>, vector<1x1x8x8xbf16>,
      %179 = vector.extract_strided_slice %73 {offsets = [0, 24], sizes = [8, 8], strides = [1, 1]} : vector<8x32xf32> to vector<8x8xf32>
      %180 = arith.truncf %179 : vector<8x8xf32> to vector<8x8xbf16>
      %c0_94 = arith.constant 0 : index
      %c3_95 = arith.constant 3 : index
      %c0_96 = arith.constant 0 : index
      %c0_97 = arith.constant 0 : index
      %181 = vector.load %arg15[%c0_94, %c3_95, %c0_96, %c0_97] : memref<1x4x8x8xbf16, #tpu.memory_space<vmem>>, vector<1x1x8x8xbf16>
      %182 = vector.shape_cast %181 : vector<1x1x8x8xbf16> to vector<8x8xbf16>
      %183 = vector.shape_cast %180 : vector<8x8xbf16> to vector<1x1x8x8xbf16>
      tpu.vector_store %arg15[%c0_94, %c3_95, %c0_96, %c0_97], %183 {strides = array<i32>} : memref<1x4x8x8xbf16, #tpu.memory_space<vmem>>, vector<1x1x8x8xbf16>,
    } else {
    }
    return
  }
  func.func @transform_0(%arg0: i32, %arg1: i32, %arg2: i32) -> (i32, i32, i32) {
    %c0_i32 = arith.constant 0 : i32
    return %arg0, %arg1, %arg2 : i32, i32, i32
  }
  func.func @transform_1(%arg0: i32, %arg1: i32, %arg2: i32) -> (i32, i32) {
    %c0_i32 = arith.constant 0 : i32
    %c0_i32_0 = arith.constant 0 : i32
    return %arg2, %c0_i32 : i32, i32
  }
  func.func @transform_2(%arg0: i32, %arg1: i32, %arg2: i32) -> (i32, i32) {
    %c0_i32 = arith.constant 0 : i32
    %c0_i32_0 = arith.constant 0 : i32
    return %arg2, %c0_i32 : i32, i32
  }
  func.func @transform_3(%arg0: i32, %arg1: i32, %arg2: i32) -> (i32, i32) {
    %c0_i32 = arith.constant 0 : i32
    %c0_i32_0 = arith.constant 0 : i32
    return %arg2, %c0_i32 : i32, i32
  }
  func.func @transform_4(%arg0: i32, %arg1: i32, %arg2: i32) -> (i32, i32) {
    %c0_i32 = arith.constant 0 : i32
    %c0_i32_0 = arith.constant 0 : i32
    %c0_i32_1 = arith.constant 0 : i32
    return %c0_i32, %c0_i32_0 : i32, i32
  }
  func.func @transform_5(%arg0: i32, %arg1: i32, %arg2: i32) -> (i32, i32) {
    %c0_i32 = arith.constant 0 : i32
    %c0_i32_0 = arith.constant 0 : i32
    %c0_i32_1 = arith.constant 0 : i32
    return %c0_i32, %c0_i32_0 : i32, i32
  }
  func.func @transform_6(%arg0: i32, %arg1: i32, %arg2: i32) -> (i32, i32) {
    %c0_i32 = arith.constant 0 : i32
    %c0_i32_0 = arith.constant 0 : i32
    %c0_i32_1 = arith.constant 0 : i32
    return %c0_i32, %c0_i32_0 : i32, i32
  }
  func.func @transform_7(%arg0: i32, %arg1: i32, %arg2: i32) -> (i32, i32) {
    %c0_i32 = arith.constant 0 : i32
    %c0_i32_0 = arith.constant 0 : i32
    %c0_i32_1 = arith.constant 0 : i32
    return %c0_i32, %c0_i32_0 : i32, i32
  }
  func.func @transform_8(%arg0: i32, %arg1: i32, %arg2: i32) -> (i32, i32) {
    %c0_i32 = arith.constant 0 : i32
    %c0_i32_0 = arith.constant 0 : i32
    return %arg1, %c0_i32 : i32, i32
  }
  func.func @transform_9(%arg0: i32, %arg1: i32, %arg2: i32) -> (i32, i32) {
    %c0_i32 = arith.constant 0 : i32
    %c0_i32_0 = arith.constant 0 : i32
    return %arg1, %c0_i32 : i32, i32
  }
  func.func @transform_10(%arg0: i32, %arg1: i32, %arg2: i32) -> (i32, i32, i32, i32) {
    %c0_i32 = arith.constant 0 : i32
    %c0_i32_0 = arith.constant 0 : i32
    %c0_i32_1 = arith.constant 0 : i32
    return %arg0, %c0_i32, %arg1, %c0_i32_0 : i32, i32, i32, i32
  }
  func.func @transform_11(%arg0: i32, %arg1: i32, %arg2: i32) -> (i32, i32, i32, i32) {
    %c0_i32 = arith.constant 0 : i32
    %c0_i32_0 = arith.constant 0 : i32
    %c0_i32_1 = arith.constant 0 : i32
    return %arg0, %c0_i32, %arg1, %c0_i32_0 : i32, i32, i32, i32
  }
  func.func @transform_12(%arg0: i32, %arg1: i32, %arg2: i32) -> (i32, i32, i32, i32) {
    %c0_i32 = arith.constant 0 : i32
    %c0_i32_0 = arith.constant 0 : i32
    %c0_i32_1 = arith.constant 0 : i32
    return %arg0, %c0_i32, %arg1, %c0_i32_0 : i32, i32, i32, i32
  }
}

</mosaic_0001>

<bundles_post_ra>
// kernel: tpu_custom_call.1
= control target key start
LH: loop header
LB: loop body
LE: loop exit
PB: predicated region body
PF: predicated region fallthrough
CT: control target
= control target key end

     0   :  { %s2572_s0 = inlined_call_operand.hbm [shape: bf16[2,8,32], index: 0, kind: input, shape index: {}]   ;;  %s2573_s1 = inlined_call_operand.hbm [shape: bf16[32,32], index: 1, kind: input, shape index: {}]   ;;  %s2574_s2 = inlined_call_operand.hbm [shape: bf16[32,32], index: 2, kind: input, shape index: {}]   ;;  %s2575_s3 = inlined_call_operand.hbm [shape: bf16[32,32], index: 3, kind: input, shape index: {}]   ;;  %s2576_s4 = inlined_call_operand.hbm [shape: f32[1,32], index: 4, kind: input, shape index: {}]   ;;  %s2577_s5 = inlined_call_operand.hbm [shape: f32[1,32], index: 5, kind: input, shape index: {}]   ;;  %s2578_s6 = inlined_call_operand.hbm [shape: f32[1,32], index: 6, kind: input, shape index: {}]   ;;  %s2579_s7 = inlined_call_operand.hbm [shape: f32[1,32], index: 7, kind: input, shape index: {}]   ;;  %s2580_s8 = inlined_call_operand.vmem [shape: f32[8,8], index: 8, kind: input, shape index: {}]   ;;  %s2581_s9 = inlined_call_operand.vmem [shape: f32[8,8], index: 9, kind: input, shape index: {}]   ;;  %s2582_s10 = inlined_call_operand.hbm [shape: bf16[2,4,8,8], index: 10, kind: output, shape index: {0}]   ;;  %s2583_s11 = inlined_call_operand.hbm [shape: bf16[2,4,8,8], index: 11, kind: output, shape index: {1}]   ;;  %s2584_s12 = inlined_call_operand.hbm [shape: bf16[2,4,8,8], index: 12, kind: output, shape index: {2}]  }
   0x1   :  { %2591 = sst [smem:[#allocation30_spill]] %s2573_s1 }
   0x2   :  { %2592 = sst [smem:[#allocation31_spill]] %s2574_s2 }
   0x3   :  { %2593 = sst [smem:[#allocation32_spill]] %s2575_s3 }
   0x4   :  { %2594 = sst [smem:[#allocation33_spill]] %s2576_s4 }
   0x5   :  { %2595 = sst [smem:[#allocation34_spill]] %s2577_s5 }
   0x6   :  { %2596 = sst [smem:[#allocation35_spill]] %s2578_s6 }
   0x7   :  { %2597 = sst [smem:[#allocation36_spill]] %s2579_s7 }
   0x8   :  { %2598 = sst [smem:[#allocation37_spill]] %s2582_s10 }
   0x9   :  { %2599 = sst [smem:[#allocation38_spill]] %s2584_s12 }
   0xa   :  { %18 = vsyncpa [#allocation6], 0 }
   0xb   :  { %20 = vsyncpa [#allocation6 + $0x1], 0 }
   0xc   :  { %21 = vsyncpa [#allocation9], 0 }
   0xd   :  { %22 = vsyncpa [#allocation12], 0 }
   0xe   :  { %23 = vsyncpa [#allocation15], 0 }
   0xf   :  { %24 = vsyncpa [#allocation18], 0 }
  0x10   :  { %25 = vsyncpa [#allocation7], 0 }
  0x11   :  { %27 = vsyncpa [#allocation7 + $0x1], 0 }
  0x12   :  { %28 = vsyncpa [#allocation21], 0 }
  0x13   :  { %30 = vsyncpa [#allocation21 + $0x1], 0  ;;  %s2123_s21 = smov 0   ;;  %s2125_s22 = smov 0  }
  0x14   :  { %s2127_s23 = smov 0   ;;  %s2129_s24 = smov 0  }
  0x15   :  { %s2131_s25 = smov 0   ;;  %s2133_s26 = smov 0  }
  0x16 LB: > { %s2154_s27 = sadd.s32 4294967295, %s2029_s26   ;;  %p1390_p0 = scmp.ge.s32.totalorder %s2029_s26, 1  ;;  %s2029_s26 = sphi %s2133_s26, %s36_s26   ;;  %s2025_s25 = sphi %s2131_s25, %s2635_s25   ;;  %s2021_s24 = sphi %s2129_s24, %s2634_s24   ;;  %s2017_s23 = sphi %s2127_s23, %s2633_s23   ;;  %s2013_s22 = sphi %s2125_s22, %s2632_s22   ;;  %s2009_s21 = sphi %s2123_s21, %s2631_s21  }
  0x17   : > { %p2589_p1 = scmp.eq.s32.totalorder %s2154_s27, 0  ;;  %p388_p2 = scmp.lt.s32.totalorder %s2029_s26, 3 }
  0x18   : > { %s2031_s29 = smov [#allocation8]   ;;  %s2032_s14 = smov [#allocation11]  }
  0x19   : > { %p2159_p3 = pnand %p1390_p0, %p388_p2  ;;  %s403_s30 = sshll.u32 %s2031_s29, 4  ;;  %s404_s30 = int_to_ptr.vmem [resolvable:$true] %s403_s30 }
  0x1a   : > { %s435_s15 = sshll.u32 %s2032_s14, 4  ;;  %s2033_s16 = smov [#allocation14]   ;;  %s436_s15 = int_to_ptr.vmem [resolvable:$true] %s435_s15 }
  0x1b   : > { %p1534_p4 = pneg %p2159_p3  ;;  %s460_s17 = sshll.u32 %s2033_s16, 4  ;;  %s461_s17 = int_to_ptr.vmem [resolvable:$true] %s460_s17 }
  0x1c   : > { %s1678_s19 = scalar_lea.vmem %s404_s30, 256  ;;  %p1686_p11 = scmp.lt.s32.totalorder %s404_s30, %s404_s30 }
  0x1d   : > { %p2168_p6 = pnand %p1534_p4, %p2589_p1  ;;  %p1679_p8 = scmp.ne.s32.totalorder %s404_s30, %s1678_s19 }
  0x1e   : > { %p1687_p12 = scmp.lt.s32.totalorder %s1678_s19, %s1678_s19 }
  0x1f   : > { %p2174_p7 = pneg %p2168_p6 }
  0x20   : > { %p1688_p13 = por %p1687_p12, %p1686_p11 }
  0x21   : > { %p1681_p9 = pnand %p1679_p8, %p2174_p7 }
  0x23   : > { %p1682_p10 = pneg %p1681_p9 }
  0x25   : > { %p1689_p0 = pnand %p1688_p13, %p1682_p10 }
  0x27   : > { %1692 = shalt.err (!%p1689_p0)
}
  0x28   : > { %s2587_s20 = smov 64   ;;  %s2588_s29 = smov 4  }
  0x29   : > { %s2603_s1 = sld [smem:[#allocation30_spill]]  ;;  %s1704_s10 = scalar_lea.vmem %s436_s15, 256 }
  0x2a   : > { %p1705_p2 = scmp.ne.s32.totalorder %s436_s15, %s1704_s10  ;;  %p1712_p9 = scmp.lt.s32.totalorder %s436_s15, %s436_s15 }
  0x2b   : > { %p1713_p10 = scmp.lt.s32.totalorder %s1704_s10, %s1704_s10 }
  0x2c   : > { %p1707_p4 = pnand %p1705_p2, %p2174_p7 }
  0x2d   : > { %p1714_p11 = por %p1713_p10, %p1712_p9 }
  0x2e   : > { %p1708_p8 = pneg %p1707_p4 }
  0x2f   : > { %1537 = dma.hbm_to_vmem [thread:$0]  (!%p2168_p6), %s2603_s1, 256, %s404_s30, [#allocation9], %s2587_s20, %s2587_s20, %s2588_s29  }
  0x30   : > { %p1715_p12 = pnand %p1714_p11, %p1708_p8 }
  0x32   : > { %1718 = shalt.err (!%p1715_p12)
}
  0x33   : > { %s2604_s3 = sld [smem:[#allocation32_spill]]  ;;  %s1730_s30 = scalar_lea.vmem %s461_s17, 16 }
  0x34   : > { %p1731_p13 = scmp.ne.s32.totalorder %s461_s17, %s1730_s30  ;;  %s1737_s10 = scalar_lea.vmem %s461_s17, 32 }
  0x35   : > { %p1738_p4 = scmp.lt.s32.totalorder %s461_s17, %s461_s17  ;;  %p1739_p8 = scmp.lt.s32.totalorder %s1737_s10, %s1730_s30 }
  0x36   : > { %p1733_p0 = pnand %p1731_p13, %p2174_p7 }
  0x37   : > { %p1740_p9 = por %p1739_p8, %p1738_p4 }
  0x38   : > { %p1734_p2 = pneg %p1733_p0 }
  0x39   : > { %1543 = dma.hbm_to_vmem [thread:$0]  (!%p2168_p6), %s2604_s3, 256, %s436_s15, [#allocation12], %s2587_s20, %s2587_s20, %s2588_s29  }
  0x3a   : > { %p1741_p10 = pnand %p1740_p9, %p1734_p2 }
  0x3c   : > { %1744 = shalt.err (!%p1741_p10)
}
  0x3d   : > { %s2605_s5 = sld [smem:[#allocation34_spill]]  ;;  %s2036_s12 = smov [#allocation10]  }
  0x3e   : > { %s419_s15 = sshll.u32 %s2036_s12, 4  ;;  %s2037_s19 = smov [#allocation13]   ;;  %s420_s15 = int_to_ptr.vmem [resolvable:$true] %s419_s15 }
  0x3f   : > { %s449_s20 = sshll.u32 %s2037_s19, 4  ;;  %s1756_s29 = scalar_lea.vmem %s420_s15, 256  ;;  %s450_s20 = int_to_ptr.vmem [resolvable:$true] %s449_s20 }
  0x40   : > { %p1757_p11 = scmp.ne.s32.totalorder %s420_s15, %s1756_s29  ;;  %p1764_p0 = scmp.lt.s32.totalorder %s420_s15, %s420_s15 }
  0x41   : > { %p1765_p2 = scmp.lt.s32.totalorder %s1756_s29, %s1756_s29 }
  0x42   : > { %p1759_p12 = pnand %p1757_p11, %p2174_p7 }
  0x43   : > { %1549 = dma.hbm_to_vmem [thread:$0]  (!%p2168_p6), %s2605_s5, 16, %s461_s17, [#allocation15]  }
  0x44   : > { %p1760_p13 = pneg %p1759_p12  ;;  %p1766_p4 = por %p1765_p2, %p1764_p0 }
  0x46   : > { %p1767_p8 = pnand %p1766_p4, %p1760_p13 }
  0x48   : > { %1770 = shalt.err (!%p1767_p8)
}
  0x49   : > { %s2606_s30 = smov 4   ;;  %s2607_s10 = smov 64  }
  0x4a   : > { %s2608_s2 = sld [smem:[#allocation31_spill]]  ;;  %s1782_s16 = scalar_lea.vmem %s450_s20, 16 }
  0x4b   : > { %p1783_p9 = scmp.ne.s32.totalorder %s450_s20, %s1782_s16  ;;  %s1789_s29 = scalar_lea.vmem %s450_s20, 32 }
  0x4c   : > { %p1790_p12 = scmp.lt.s32.totalorder %s450_s20, %s450_s20  ;;  %p1791_p13 = scmp.lt.s32.totalorder %s1789_s29, %s1782_s16 }
  0x4d   : > { %p1785_p10 = pnand %p1783_p9, %p2174_p7 }
  0x4e   : > { %p1792_p0 = por %p1791_p13, %p1790_p12 }
  0x4f   : > { %p1786_p11 = pneg %p1785_p10 }
  0x50   : > { %1540 = dma.hbm_to_vmem [thread:$0]  (!%p2168_p6), %s2608_s2, 256, %s420_s15, [#allocation9], %s2607_s10, %s2607_s10, %s2606_s30  }
  0x51   : > { %p1793_p2 = pnand %p1792_p0, %p1786_p11 }
  0x53   : > { %1796 = shalt.err (!%p1793_p2)
}
  0x54   : > { %s2609_s4 = sld [smem:[#allocation33_spill]]  ;;  %s2038_s15 = smov [#allocation16]  }
  0x55   : > { %s471_s30 = sshll.u32 %s2038_s15, 4  ;;  %s2039_s10 = smov [#allocation17]   ;;  %s472_s30 = int_to_ptr.vmem [resolvable:$true] %s471_s30 }
  0x56   : > { %s482_s17 = sshll.u32 %s2039_s10, 4  ;;  %s1808_s14 = scalar_lea.vmem %s472_s30, 16  ;;  %s483_s17 = int_to_ptr.vmem [resolvable:$true] %s482_s17 }
  0x57   : > { %p1809_p4 = scmp.ne.s32.totalorder %s472_s30, %s1808_s14  ;;  %s1815_s16 = scalar_lea.vmem %s472_s30, 32 }
  0x58   : > { %p1816_p10 = scmp.lt.s32.totalorder %s472_s30, %s472_s30  ;;  %p1817_p11 = scmp.lt.s32.totalorder %s1815_s16, %s1808_s14 }
  0x59   : > { %p1811_p8 = pnand %p1809_p4, %p2174_p7 }
  0x5a   : > { %1546 = dma.hbm_to_vmem [thread:$0]  (!%p2168_p6), %s2609_s4, 16, %s450_s20, [#allocation12]  }
  0x5b   : > { %p1812_p9 = pneg %p1811_p8  ;;  %p1818_p12 = por %p1817_p11, %p1816_p10 }
  0x5d   : > { %p1819_p13 = pnand %p1818_p12, %p1812_p9 }
  0x5f   : > { %1822 = shalt.err (!%p1819_p13)
}
  0x60   : > { %s2610_s6 = sld [smem:[#allocation35_spill]]  ;;  %s1834_s12 = scalar_lea.vmem %s483_s17, 16 }
  0x61   : > { %p1835_p0 = scmp.ne.s32.totalorder %s483_s17, %s1834_s12  ;;  %s1841_s19 = scalar_lea.vmem %s483_s17, 32 }
  0x62   : > { %p1842_p8 = scmp.lt.s32.totalorder %s483_s17, %s483_s17  ;;  %p1843_p5 = scmp.lt.s32.totalorder %s1841_s19, %s1834_s12 }
  0x63   : > { %p1837_p2 = pnand %p1835_p0, %p2174_p7 }
  0x64   : > { %p1844_p1 = por %p1843_p5, %p1842_p8 }
  0x65   : > { %p1838_p4 = pneg %p1837_p2 }
  0x66   : > { %1552 = dma.hbm_to_vmem [thread:$0]  (!%p2168_p6), %s2610_s6, 16, %s472_s30, [#allocation15]  }
  0x67   : > { %p1845_p10 = pnand %p1844_p1, %p1838_p4 }
  0x69   : > { %1848 = shalt.err (!%p1845_p10)
}
  0x6a   : > { %s2611_s7 = sld [smem:[#allocation36_spill]]  ;;  %s2590_s18 = sadd.s32 4294967294, %s2029_s26  }
  0x6b   : > { %s55_s13 = sadd.s32 1, %s2025_s25  ;;  %s66_s30 = sadd.s32 1, %s2017_s23 }
  0x6c   : > { %p57_p1 = scmp.ge.s32.totalorder %s55_s13, 2  ;;  %p73_p5 = scmp.ne.s32.totalorder %s2017_s23, %s2013_s22 }
  0x6d   : > { %p74_p7 = scmp.eq.s32.totalorder %s2029_s26, 0  ;;  %p79_p9 = scmp.ne.s32.totalorder %s2013_s22, %s2009_s21 }
  0x6e   : > { %s2637_s13 = smov (%p57_p1, %s55_s13), 0  ;;  %p2613_p12 = scmp.eq.s32.totalorder %s2154_s27, 0 }
  0x6f   : > { %p2246_p11 = por %p74_p7, %p73_p5  ;;  %s59_s16 = ssub.s32 %s2025_s25, %s2637_s13 }
  0x70   : > { %1555 = dma.hbm_to_vmem [thread:$0]  (!%p2168_p6), %s2611_s7, 16, %s483_s17, [#allocation18]  }
  0x71   : > { %p2252_p6 = por %p2613_p12, %p79_p9  ;;  %p319_p13 = scmp.eq.s32.totalorder %s2154_s27, 1 }
  0x72   : > { %p64_p0 = scmp.eq.s32.totalorder %s59_s16, 0  ;;  %p325_p2 = scmp.eq.s32.totalorder %s2590_s18, 1 }
  0x73   : > { %p2261_p4 = por %p319_p13, %p73_p5  ;;  %p1577_p8 = scmp.lt.s32.totalorder %s2029_s26, 2 }
  0x74   : > { %s2267_s20 = scalar_select %p64_p0, %s2017_s23, %s66_s30  }
  0x75   : > { %p2269_p10 = por %p325_p2, %p79_p9  ;;  %s507_s19 = sand.u32 1, %s2017_s23  }
  0x76   : > { %s1401_s15 = sshll.u32 %s507_s19, 2  ;;  %s1402_s10 = sshll.u32 %s2025_s25, 6 }
  0x77   : > { %s2616_s12 = scalar_select %p2269_p10, 1, 0 }
  0x78   : > { %s518_s16 = scalar_lea.hbm %s2572_s0, %s1402_s10  ;;  %s511_s3 = scalar_lea.vmem [#allocation5], %s1401_s15 }
  0x79   : > { %s520_s18 = sshll.u32 %s511_s3, 4  ;;  %p2280_p1 = pnand %p1577_p8, %p2246_p11  ;;  %s521_s18 = int_to_ptr.vmem [resolvable:$true] %s520_s18 }
  0x7a   : > { %s508_s30 = scalar_lea.sflag [#allocation6], %s507_s19  ;;  %s1862_s5 = scalar_lea.vmem %s521_s18, 64 }
  0x7b   : > { %p1851_p5 = pneg %p2280_p1  ;;  %p1863_p7 = scmp.ne.s32.totalorder %s521_s18, %s1862_s5 }
  0x7c   : > { %s2040_s6 = smov [#allocation5]  }
  0x7d   : > { %p1865_p9 = pnand %p1863_p7, %p1851_p5  ;;  %s1867_s7 = sshll.u32 %s2040_s6, 4  ;;  %s1868_s7 = int_to_ptr.vmem [resolvable:$false] %s1867_s7 }
  0x7e   : > { %s1869_s1 = scalar_lea.vmem %s1868_s7, 128  ;;  %p1870_p13 = scmp.lt.s32.totalorder %s521_s18, %s1868_s7 }
  0x7f   : > { %p1866_p12 = pneg %p1865_p9  ;;  %p1871_p0 = scmp.lt.s32.totalorder %s1869_s1, %s1862_s5 }
  0x81   : > { %p1872_p2 = por %p1871_p0, %p1870_p13 }
  0x83   : > { %p1873_p10 = pnand %p1872_p2, %p1866_p12 }
  0x85   : > { %1876 = shalt.err (!%p1873_p10)
}
  0x86   : > { %1559 = dma.hbm_to_vmem [thread:$0]  (!%p2280_p1), %s518_s16, 64, %s521_s18, %s508_s30  }
  0x87   : > { %529 = sbr.rel (%p2159_p3) target bundleno = 952 (0x3b8), region = 60  ;;  %s2291_s2 = sand.u32 (!%p2159_p3), 1, %s2013_s22  }
  0x88   : > { %s1404_s3 = sshll.u32 (!%p2159_p3), %s2291_s2, 2  ;;  %s532_s6 = scalar_lea.sflag (!%p2159_p3), [#allocation6], %s2291_s2 }
  0x89   : > { %s535_s14 = scalar_lea.vmem (!%p2159_p3), [#allocation5], %s1404_s3 }
  0x8c   : > { %1980 = dma.done.wait (%p2252_p6), %s532_s6, 64  }
  0x8d   : > { %1982 = vsyncadd (%p2252_p6), %s532_s6, 4294967232  ;;  %p2618_p11 = scmp.eq.s32.totalorder %s2154_s27, 0 }
  0x8f   : > { %1984 = dma.done.wait (%p2618_p11), [#allocation9], 512   ;;  %p2619_p8 = pmov %p2618_p11 }
  0x91   : > { %1986 = vsyncadd (%p2619_p8), [#allocation9], 4294966784  ;;  %p2620_p3 = pmov %p2619_p8 }
  0x93   : > { %1988 = dma.done.wait (%p2620_p3), [#allocation12], 272   ;;  %p2621_p10 = pmov %p2620_p3 }
  0x94   : > { %p2622_p1 = pmov %p2620_p3 }
  0x95   : > { %1990 = vsyncadd (%p2621_p10), [#allocation12], 4294967024 }
  0x96   : > { %1992 = dma.done.wait (%p2622_p1), [#allocation15], 32   ;;  %p2623_p5 = pmov %p2622_p1 }
  0x97   : > { %p2624_p6 = pmov %p2622_p1 }
  0x98   : > { %1994 = vsyncadd (%p2623_p5), [#allocation15], 4294967264 }
  0x99   : > { %1996 = dma.done.wait (%p2624_p6), [#allocation18], 16   ;;  %p2625_p7 = pmov %p2622_p1 }
  0x9a   : > { %vm638_vm0 = vcmask 261120   ;;  %v2041_v0 = vmov 0.0   ;;  %vm2042_vm1 = vmmov 0   ;;  %v1657_v1 = vld [vmem:[#allocation10 + $0x8] sm:$0xff]   ;;  %v1658_v2 = vld [vmem:[#allocation8 + $0x8] sm:$0xff]   ;;  %v1659_v3 = vld [vmem:[#allocation10] sm:$0xff]  }
  0x9b   : > { %1998 = vsyncadd (%p2625_p7), [#allocation18], 4294967280  ;;  %1482 = vmatprep.subr.bf16.mxu1 %v2041_v0  ;;  %1474 = vmatprep.subr.bf16.mxu0 %v2041_v0  ;;  %639 = vst.msk [vmem:[#allocation2] sm:$0xff] %vm638_vm0, %v2041_v0  ;;  %v1660_v4 = vld [vmem:[#allocation8] sm:$0xff]   ;;  %v642_v5 = vld [vmem:[%s535_s14] sm:$0xf] }
  0x9c   : > { %640 = vst.msk [vmem:[#allocation3] sm:$0xff] %vm638_vm0, %v2041_v0  ;;  %641 = vst.msk [vmem:[#allocation4] sm:$0xff] %vm638_vm0, %v2041_v0  ;;  %1486 = vmatprep.mubr.msk.bf16.mxu1 %vm2042_vm1, %v2041_v0  ;;  %1478 = vmatprep.mubr.msk.bf16.mxu0 %vm2042_vm1, %v2041_v0  ;;  %v1661_v26 = vld [vmem:[#allocation11 + $0x8] sm:$0xff]   ;;  %v1662_v27 = vld [vmem:[#allocation11] sm:$0xff]   ;;  %s2043_s4 = smov 116   ;;  %s2044_s5 = smov 124  }
  0x9d   : > { %1483 = vmatpush3.bf16.msra.mxu1 %v1657_v1  ;;  %1475 = vmatpush3.bf16.msra.mxu0 %v1658_v2  ;;  %v1426_v44 = vld [vmem:[#allocation16] ss:$0 sm:$0xff]  ;;  %v1427_v46 = vld [vmem:[#allocation17] ss:$0 sm:$0xff]  ;;  %v1424_v50 = vld [vmem:[#allocation13] ss:$0 sm:$0xff] }
  0x9e   : > { %1484 = vmatprep.subr.bf16.mxu1 %v2041_v0  ;;  %1476 = vmatprep.subr.bf16.mxu0 %v2041_v0  ;;  %v1425_v53 = vld [vmem:[#allocation14] ss:$0 sm:$0xff]  ;;  %s2045_s7 = smov 108   ;;  %s2046_s28 = smov 100   ;;  %v2343_v56 = vld [vmem:[%s2581_s9] sm:$0xff]  ;;  %vm902_vm2 = vcmask 31744  }
  0x9f   : > { %s2047_s19 = smov 8   ;;  %s2048_s15 = smov 24   ;;  %vm908_vm3 = vcmask 60416   ;;  %v2362_v1 = vld [vmem:[%s2580_s8] sm:$0xff] }
  0xa0   : > { %s2049_s10 = smov 16   ;;  %s2357_s16 = sshll.u32 %s2291_s2, 4 }
  0xa1   : > { %1485 = vmatpush3.bf16.msra.mxu1 %v1659_v3  ;;  %1477 = vmatpush3.bf16.msra.mxu0 %v1660_v4  ;;  %s2365_s3 = scalar_lea.vmem [#allocation22], %s2357_s16  ;;  %s2050_s6 = smov 4  }
  0xa2   : > { %1490 = vmatprep.subr.bf16.mxu0 %v2041_v0  ;;  %v643_v7 = vld [vmem:[#allocation2] sm:$0xff]  ;;  %s2051_s14 = smov 120   ;;  %s1078_s17 = sand.u32 1, %s2154_s27  }
  0xa3   : > { %v706_v6 = vld [vmem:[#allocation3] sm:$0xff]  ;;  %v765_v57 = vld [vmem:[#allocation4] sm:$0xff]  ;;  %s1132_s30 = sshll.u32 %s2365_s3, 4  ;;  %s2446_s27 = scalar_lea.sflag [#allocation21], %s1078_s17  ;;  %s2474_s30 = int_to_ptr.vmem [resolvable:$true] %s1132_s30 }
  0xa4   : > { %1487 = vmatmul.mubr.msk.bf16.vlgmr.msra.gmra.mxu1 %vm638_vm0, %v642_v5  ;;  %1479 = vmatmul.mubr.msk.bf16.vlgmr.msra.gmra.mxu0 %vm638_vm0, %v642_v5  ;;  %s2054_s1 = smov [#allocation20]  }
  0xa5   : > { %1494 = vmatprep.mubr.msk.bf16.mxu0 %vm2042_vm1, %v2041_v0  ;;  %1491 = vmatpush3.bf16.msra.mxu0 %v1661_v26 }
  0xa6   : > { %1492 = vmatprep.subr.bf16.mxu0 %v2041_v0 }
  0xa9   : > { %1493 = vmatpush3.bf16.msra.mxu0 %v1662_v27 }
  0xac   : > { %1495 = vmatmul.mubr.msk.bf16.vlgmr.msra.gmra.mxu0 %vm638_vm0, %v642_v5 }
 0x164   : > { %v757_v8 = vpop.f32.mrf.mxu1  ;;  %v698_v10 = vpop.f32.mrf.mxu0 }
 0x165   : > { %v763_v9 = vadd.f32 %v757_v8, %v706_v6  ;;  %v704_v12 = vadd.f32 %v698_v10, %v643_v7 }
 0x166   : > { %v1488_v11 = vpop.f32.mrf.mxu1  ;;  %v1480_v13 = vpop.f32.mrf.mxu0 }
 0x167   : > { %764 = vst.msk [vmem:[#allocation3] sm:$0xff] %vm638_vm0, %v763_v9  ;;  %705 = vst.msk [vmem:[#allocation2] sm:$0xff] %vm638_vm0, %v704_v12 }
 0x168   : > { %v760_v14 = vpop.f32.mrf.mxu1  ;;  %v701_v15 = vpop.f32.mrf.mxu0 }
 0x16a   : > { %v1489_v16 = vpop.f32.mrf.mxu1  ;;  %v1481_v17 = vpop.f32.mrf.mxu0 }
 0x16c   : > { %v816_v58 = vpop.f32.mrf.mxu0 }
 0x16d   : > { %v822_v59 = vadd.f32 %v816_v58, %v765_v57 }
 0x16e   : > { %v860_v18 = vld [vmem:[#allocation3] sm:$0xff]  ;;  %v827_v21 = vld [vmem:[#allocation2] sm:$0xff]  ;;  %v1496_v60 = vpop.f32.mrf.mxu0 }
 0x16f   : > { %v863_v19 = vsel %vm638_vm0, %v860_v18, 0.0  ;;  %v867_v20 = vmul.f32 %v860_v18, %v860_v18  ;;  %v835_v22 = vmul.f32 %v827_v21, %v827_v21  ;;  %v830_v24 = vsel %vm638_vm0, %v827_v21, 0.0  ;;  %823 = vst.msk [vmem:[#allocation4] sm:$0xff] %vm638_vm0, %v822_v59 }
 0x170   : > { %864 = vadd.xlane.f32.xlu0 %v863_v19  ;;  %v819_v61 = vpop.f32.mrf.mxu0 }
 0x171   : > { %v868_v23 = vsel %vm638_vm0, %v867_v20, 0.0  ;;  %v836_v25 = vsel %vm638_vm0, %v835_v22, 0.0 }
 0x172   : > { %869 = vadd.xlane.f32.xlu1 %v868_v23  ;;  %v1497_v62 = vpop.f32.mrf.mxu0 }
 0x174   : > { %831 = vadd.xlane.f32.xlu0 %v830_v24 }
 0x176   : > { %837 = vadd.xlane.f32.xlu1 %v836_v25  ;;  %v892_v63 = vld [vmem:[#allocation4] sm:$0xff] }
 0x177   : > { %v2354_v0 = vpack.c.bf16 %v892_v63, %v892_v63 }
 0x179   : > { %924 = vst.msk [vmem:[%s2365_s3] sm:$0xf] %vm908_vm3, %v2354_v0 }
 0x1f9   : > { %v865_v28 = vpop.xlane.xlu0 %864 }
 0x1fa   : > { %v866_v29 = vmul.f32 0.03125, %v865_v28 }
 0x1fb   : > { %v870_v30 = vpop.xlane.xlu1 %869 }
 0x1fc   : > { %v872_v31 = vmul.f32 %v866_v29, %v866_v29  ;;  %v871_v32 = vmul.f32 0.03125, %v870_v30  ;;  %v874_v42 = vsub.f32 %v860_v18, %v866_v29 }
 0x1fd   : > { %v832_v33 = vpop.xlane.xlu0 %831 }
 0x1fe   : > { %v873_v34 = vsub.f32 %v871_v32, %v872_v31  ;;  %v834_v35 = vmul.f32 0.03125, %v832_v33 }
 0x1ff   : > { %v838_v36 = vpop.xlane.xlu1 %837 }
 0x200   : > { %v875_v37 = vadd.f32 1e-05, %v873_v34  ;;  %v840_v38 = vmul.f32 %v834_v35, %v834_v35  ;;  %v839_v39 = vmul.f32 0.03125, %v838_v36  ;;  %v842_v48 = vsub.f32 %v827_v21, %v834_v35 }
 0x202   : > { %1663 = vrsqrt.f32 %v875_v37  ;;  %v841_v40 = vsub.f32 %v839_v39, %v840_v38 }
 0x204   : > { %v843_v41 = vadd.f32 1e-05, %v841_v40 }
 0x206   : > { %1665 = vrsqrt.f32 %v843_v41 }
 0x20f   : > { %v1664_v43 = vpop.eup %1663 }
 0x210   : > { %v877_v45 = vmul.f32 %v1664_v43, %v874_v42 }
 0x212   : > { %v884_v47 = vmul.f32 %v1426_v44, %v877_v45 }
 0x213   : > { %v1666_v49 = vpop.eup %1665 }
 0x214   : > { %v2330_v51 = vadd.f32 %v1427_v46, %v884_v47  ;;  %v845_v52 = vmul.f32 %v1666_v49, %v842_v48 }
 0x216   : > { %v852_v54 = vmul.f32 %v1424_v50, %v845_v52  ;;  %949 = vrot.lane.b32.xlu1 %v2330_v51, %s2043_s4  ;;  %911 = vrot.lane.b32.xlu0 %v2330_v51, %s2044_s5  ;;  %v918_v48 = vmul.f32 %v2343_v56, %v2330_v51 }
 0x218   : > { %v2334_v55 = vadd.f32 %v1425_v53, %v852_v54 }
 0x21a   : > { %1000 = vrot.lane.b32.xlu1 %v2330_v51, %s2045_s7  ;;  %896 = vrot.lane.b32.xlu0 %v2334_v55, %s2044_s5  ;;  %s2053_s5 = smov 104  }
 0x21e   : > { %1048 = vrot.lane.b32.xlu1 %v2330_v51, %s2046_s28  ;;  %977 = vrot.lane.b32.xlu0 %v2334_v55, %s2045_s7  ;;  %s614_s7 = scalar_lea.vmem [#allocation20], %s2357_s16 }
 0x21f   : > { %s1115_s18 = sshll.u32 %s614_s7, 4  ;;  %s2436_s18 = int_to_ptr.vmem [resolvable:$true] %s1115_s18 }
 0x222   : > { %925 = vrot.lane.b32.xlu1 %v2334_v55, %s2043_s4  ;;  %930 = vrot.lane.b32.xlu0 %v2343_v56, %s2047_s19  ;;  %s2052_s4 = smov 112  }
 0x226   : > { %1025 = vrot.lane.b32.xlu1 %v2334_v55, %s2046_s28  ;;  %1029 = vrot.lane.b32.xlu0 %v2343_v56, %s2048_s15  ;;  %s2426_s28 = scalar_lea.vmem [#allocation19], %s2357_s16 }
 0x22a   : > { %981 = vrot.lane.b32.xlu1 %v2343_v56, %s2049_s10 }
 0x288   : > { %v950_v2 = vpop.permute.xlu1 %949  ;;  %v912_v3 = vpop.permute.xlu0 %911 }
 0x289   : > { %v952_v4 = vsel %vm902_vm2, %v950_v2, %v912_v3 }
 0x28a   : > { %v954_v5 = vmul.f32 %v952_v4, %v2362_v1 }
 0x28c   : > { %v1001_v6 = vpop.permute.xlu1 %1000  ;;  %956 = vrot.lane.b32.xlu1 %v954_v5, %s2047_s19  ;;  %v2375_v9 = vpop.permute.xlu0 %896 }
 0x28d   : > { %v1003_v7 = vsel %vm902_vm2, %v1001_v6, %v950_v2 }
 0x28e   : > { %v1005_v8 = vmul.f32 %v1003_v7, %v2362_v1 }
 0x290   : > { %v1049_v10 = vpop.permute.xlu1 %1048  ;;  %1007 = vrot.lane.b32.xlu0 %v1005_v8, %s2049_s10  ;;  %v978_v13 = vpop.permute.xlu0 %977 }
 0x291   : > { %v1051_v11 = vsel %vm902_vm2, %v1049_v10, %v1001_v6 }
 0x292   : > { %v1053_v12 = vmul.f32 %v1051_v11, %v2362_v1 }
 0x294   : > { %v926_v14 = vpop.permute.xlu1 %925  ;;  %1055 = vrot.lane.b32.xlu1 %v1053_v12, %s2048_s15  ;;  %v931_v22 = vpop.permute.xlu0 %930 }
 0x295   : > { %v928_v15 = vsel %vm902_vm2, %v926_v14, %v2375_v9  ;;  %v980_v16 = vsel %vm902_vm2, %v978_v13, %v926_v14  ;;  %v953_v24 = vmul.f32 %v931_v22, %v2330_v51  ;;  %v933_v36 = vmul.f32 %v931_v22, %v2334_v55 }
 0x296   : > { %v934_v17 = vmul.f32 %v928_v15, %v2362_v1  ;;  %v985_v18 = vmul.f32 %v980_v16, %v2362_v1 }
 0x298   : > { %v1026_v19 = vpop.permute.xlu1 %1025  ;;  %936 = vrot.lane.b32.xlu0 %v934_v17, %s2047_s19  ;;  %987 = vrot.lane.b32.xlu1 %v985_v18, %s2049_s10  ;;  %v1030_v25 = vpop.permute.xlu0 %1029  ;;  %s2433_s19 = sshll.u32 %s2021_s24, 8  ;;  %s1877_s24 = scalar_lea.vmem %s2436_s18, 256 }
 0x299   : > { %v1028_v20 = vsel %vm902_vm2, %v1026_v19, %v978_v13  ;;  %v1052_v32 = vmul.f32 %v1030_v25, %v2330_v51  ;;  %v1032_v46 = vmul.f32 %v1030_v25, %v2334_v55  ;;  %s2442_s16 = scalar_lea.hbm %s2583_s11, %s2433_s19  ;;  %p1878_p9 = scmp.ne.s32.totalorder %s2436_s18, %s1877_s24 }
 0x29a   : > { %v1033_v21 = vmul.f32 %v1028_v20, %v2362_v1 }
 0x29b   : > { %p1879_p12 = pnand %p1878_p9, %p2261_p4 }
 0x29c   : > { %1035 = vrot.lane.b32.xlu0 %v1033_v21, %s2048_s15  ;;  %914 = vrot.lane.b32.xlu1 %v2330_v51, %s2050_s6  ;;  %v982_v23 = vpop.permute.xlu1 %981 }
 0x29d   : > { %v1004_v28 = vmul.f32 %v982_v23, %v2330_v51  ;;  %v984_v40 = vmul.f32 %v982_v23, %v2334_v55  ;;  %v904_v51 = vmul.f32 %v2343_v56, %v2334_v55  ;;  %p1880_p13 = pneg %p1879_p12 }
 0x2a0   : > { %899 = vrot.lane.b32.xlu0 %v2334_v55, %s2050_s6  ;;  %972 = vrot.lane.b32.xlu1 %v2354_v0, %s2051_s14 }
 0x2a4   : > { %1020 = vrot.lane.b32.xlu1 %v2354_v0, %s2052_s4 }
 0x2fe   : > { %v957_v26 = vpop.permute.xlu1 %956 }
 0x2ff   : > { %v959_v27 = vadd.f32 %v957_v26, %v953_v24 }
 0x301   : > { %v1456_v29 = vpack.c.bf16 %v959_v27, %v959_v27 }
 0x302   : > { %v1008_v30 = vpop.permute.xlu0 %1007 }
 0x303   : > { %v1010_v31 = vadd.f32 %v1008_v30, %v1004_v28  ;;  %964 = vrot.lane.b32.xlu1 %v1456_v29, %s2051_s14 }
 0x305   : > { %v1459_v33 = vpack.c.bf16 %v1010_v31, %v1010_v31 }
 0x306   : > { %v1056_v34 = vpop.permute.xlu1 %1055 }
 0x307   : > { %v1058_v35 = vadd.f32 %v1056_v34, %v1052_v32  ;;  %1015 = vrot.lane.b32.xlu0 %v1459_v33, %s2052_s4 }
 0x309   : > { %v1461_v37 = vpack.c.bf16 %v1058_v35, %v1058_v35 }
 0x30a   : > { %v988_v38 = vpop.permute.xlu1 %987  ;;  %v937_v39 = vpop.permute.xlu0 %936 }
 0x30b   : > { %v939_v41 = vadd.f32 %v937_v39, %v933_v36  ;;  %1063 = vrot.lane.b32.xlu1 %v1461_v37, %s2053_s5  ;;  %v990_v42 = vadd.f32 %v988_v38, %v984_v40 }
 0x30d   : > { %v1455_v43 = vpack.c.bf16 %v939_v41, %v939_v41  ;;  %v1458_v50 = vpack.c.bf16 %v990_v42, %v990_v42 }
 0x30e   : > { %v915_v44 = vpop.permute.xlu1 %914  ;;  %v1036_v45 = vpop.permute.xlu0 %1035 }
 0x30f   : > { %v917_v47 = vsel %vm902_vm2, %v912_v3, %v915_v44  ;;  %1068 = vrot.lane.b32.xlu1 %v2354_v0, %s2053_s5  ;;  %944 = vrot.lane.b32.xlu0 %v1455_v43, %s2051_s14  ;;  %v1038_v52 = vadd.f32 %v1036_v45, %v1032_v46  ;;  %s1881_s14 = sshll.u32 %s2054_s1, 4  ;;  %s1882_s14 = int_to_ptr.vmem [resolvable:$false] %s1881_s14 }
 0x310   : > { %v919_v49 = vmul.f32 %v917_v47, %v2362_v1  ;;  %p1884_p0 = scmp.lt.s32.totalorder %s2436_s18, %s1882_s14 }
 0x311   : > { %v1460_v61 = vpack.c.bf16 %v1038_v52, %v1038_v52 }
 0x312   : > { %v920_v53 = vadd.f32 %v919_v49, %v918_v48  ;;  %v900_v54 = vpop.permute.xlu0 %899  ;;  %v973_v57 = vpop.permute.xlu1 %972 }
 0x313   : > { %v903_v58 = vsel %vm902_vm2, %v2375_v9, %v900_v54  ;;  %995 = vrot.lane.b32.xlu0 %v1458_v50, %s2052_s4  ;;  %1433 = vst.msk [vmem:[%s2365_s3 + $0x4] sm:$0xf] %vm908_vm3, %v973_v57  ;;  %s1883_s4 = scalar_lea.vmem %s1882_s14, 512 }
 0x314   : > { %v921_v59 = vpack.c.bf16 %v920_v53, %v920_v53  ;;  %v905_v60 = vmul.f32 %v903_v58, %v2362_v1  ;;  %p1885_p2 = scmp.lt.s32.totalorder %s1883_s4, %s1877_s24 }
 0x316   : > { %v906_v62 = vadd.f32 %v905_v60, %v904_v51  ;;  %v1021_v63 = vpop.permute.xlu1 %1020  ;;  %922 = vst.msk [vmem:[%s614_s7] sm:$0xf] %vm908_vm3, %v921_v59  ;;  %p1886_p11 = por %p1885_p2, %p1884_p0 }
 0x317   : > { %1043 = vrot.lane.b32.xlu0 %v1460_v61, %s2053_s5  ;;  %1438 = vst.msk [vmem:[%s2365_s3 + $0x8] sm:$0xf] %vm908_vm3, %v1021_v63 }
 0x318   : > { %v907_v0 = vpack.c.bf16 %v906_v62, %v906_v62  ;;  %p1887_p8 = pnand %p1886_p11, %p1880_p13 }
 0x31a   : > { %909 = vst.msk [vmem:[%s2426_s28] sm:$0xf] %vm908_vm3, %v907_v0 }
 0x375   : > { %v965_v55 = vpop.permute.xlu1 %964 }
 0x376   : > { %1431 = vst.msk [vmem:[%s614_s7 + $0x4] sm:$0xf] %vm908_vm3, %v965_v55 }
 0x379   : > { %v1016_v56 = vpop.permute.xlu0 %1015 }
 0x37a   : > { %1437 = vst.msk [vmem:[%s614_s7 + $0x8] sm:$0xf] %vm908_vm3, %v1016_v56 }
 0x37d   : > { %v1064_v1 = vpop.permute.xlu1 %1063 }
 0x37e   : > { %1442 = vst.msk [vmem:[%s614_s7 + $0xc] sm:$0xf] %vm908_vm3, %v1064_v1 }
 0x37f   : > { %1890 = shalt.err (!%p1887_p8)
}
 0x380   : > { %s1891_s5 = scalar_lea.hbm %s2442_s16, 256  ;;  %s1895_s15 = scalar_lea.hbm %s2583_s11, 512 }
 0x381   : > { %p1892_p3 = scmp.ne.s32.totalorder %s2442_s16, %s1891_s5  ;;  %p1896_p5 = scmp.lt.s32.totalorder %s2442_s16, %s2583_s11 }
 0x382   : > { %p1897_p6 = scmp.lt.s32.totalorder %s1895_s15, %s1891_s5 }
 0x383   : > { %p1893_p10 = pnand %p1892_p3, %p2261_p4 }
 0x384   : > { %p1898_p7 = por %p1897_p6, %p1896_p5 }
 0x385   : > { %p1894_p1 = pneg %p1893_p10 }
 0x387   : > { %p1899_p9 = pnand %p1898_p7, %p1894_p1 }
 0x389   : > { %1902 = shalt.err (!%p1899_p9)
}
 0x38a   : > { %s2055_s24 = smov 64   ;;  %s2626_s5 = sld [smem:[#allocation38_spill]]  ;;  %v1069_v2 = vpop.permute.xlu1 %1068  ;;  %v945_v3 = vpop.permute.xlu0 %944 }
 0x38b   : > { %1529 = dma.vmem_to_hbm [thread:$0]  (%p2261_p4), %s2436_s18, 256, %s2442_s16, %s2446_s27, %s2055_s24, %s2055_s24, %s2050_s6  }
 0x38c   : > { %1443 = vst.msk [vmem:[%s2365_s3 + $0xc] sm:$0xf] %vm908_vm3, %v1069_v2  ;;  %1429 = vst.msk [vmem:[%s2426_s28 + $0x4] sm:$0xf] %vm908_vm3, %v945_v3  ;;  %s1903_s17 = scalar_lea.vmem %s2474_s30, 256  ;;  %s2056_s18 = smov [#allocation22]  }
 0x38d   : > { %p1904_p12 = scmp.ne.s32.totalorder %s2474_s30, %s1903_s17  ;;  %s1907_s16 = sshll.u32 %s2056_s18, 4  ;;  %s1908_s16 = int_to_ptr.vmem [resolvable:$false] %s1907_s16 }
 0x38e   : > { %s1909_s15 = scalar_lea.vmem %s1908_s16, 512  ;;  %p1910_p2 = scmp.lt.s32.totalorder %s2474_s30, %s1908_s16 }
 0x38f   : > { %p1905_p13 = pnand %p1904_p12, %p2261_p4  ;;  %p1911_p11 = scmp.lt.s32.totalorder %s1909_s15, %s1903_s17 }
 0x390   : > { %s2480_s7 = scalar_lea.hbm %s2626_s5, %s2433_s19 }
 0x391   : > { %p1906_p0 = pneg %p1905_p13  ;;  %p1912_p8 = por %p1911_p11, %p1910_p2 }
 0x393   : > { %p1913_p3 = pnand %p1912_p8, %p1906_p0 }
 0x395   : > { %1916 = shalt.err (!%p1913_p3)
}
 0x396   : > { %s1917_s3 = scalar_lea.hbm %s2480_s7, 256  ;;  %s1921_s14 = scalar_lea.hbm %s2626_s5, 512 }
 0x397   : > { %p1918_p10 = scmp.ne.s32.totalorder %s2480_s7, %s1917_s3  ;;  %p1922_p6 = scmp.lt.s32.totalorder %s2480_s7, %s2626_s5 }
 0x398   : > { %p1923_p7 = scmp.lt.s32.totalorder %s1921_s14, %s1917_s3 }
 0x399   : > { %p1919_p1 = pnand %p1918_p10, %p2261_p4 }
 0x39a   : > { %p1924_p9 = por %p1923_p7, %p1922_p6 }
 0x39b   : > { %p1920_p5 = pneg %p1919_p1 }
 0x39d   : > { %p1925_p12 = pnand %p1924_p9, %p1920_p5 }
 0x39f   : > { %1928 = shalt.err (!%p1925_p12)
}
 0x3a0   : > { %1530 = dma.vmem_to_hbm [thread:$0]  (%p2261_p4), %s2474_s30, 256, %s2480_s7, %s2446_s27, %s2055_s24, %s2055_s24, %s2050_s6   ;;  %v996_v4 = vpop.permute.xlu0 %995 }
 0x3a1   : > { %s1098_s17 = sshll.u32 %s2426_s28, 4  ;;  %1435 = vst.msk [vmem:[%s2426_s28 + $0x8] sm:$0xf] %vm908_vm3, %v996_v4  ;;  %s2627_s3 = sld [smem:[#allocation37_spill]]  ;;  %s2513_s17 = int_to_ptr.vmem [resolvable:$true] %s1098_s17 }
 0x3a2   : > { %s1074_s1 = scalar_lea.sflag [#allocation7], %s2291_s2  ;;  %s1929_s14 = scalar_lea.vmem %s2513_s17, 256 }
 0x3a3   : > { %p1930_p13 = scmp.ne.s32.totalorder %s2513_s17, %s1929_s14  ;;  %s2057_s30 = smov [#allocation19]  }
 0x3a4   : > { %v1044_v5 = vpop.permute.xlu0 %1043  ;;  %s1933_s27 = sshll.u32 %s2057_s30, 4  ;;  %s1934_s27 = int_to_ptr.vmem [resolvable:$false] %s1933_s27 }
 0x3a5   : > { %1440 = vst.msk [vmem:[%s2426_s28 + $0xc] sm:$0xf] %vm908_vm3, %v1044_v5  ;;  %p1931_p0 = pnand %p1930_p13, %p2261_p4  ;;  %s1935_s7 = scalar_lea.vmem %s1934_s27, 512 }
 0x3a6   : > { %p1936_p11 = scmp.lt.s32.totalorder %s2513_s17, %s1934_s27  ;;  %p1937_p8 = scmp.lt.s32.totalorder %s1935_s7, %s1929_s14 }
 0x3a7   : > { %s2519_s10 = scalar_lea.hbm %s2627_s3, %s2433_s19  ;;  %p1932_p2 = pneg %p1931_p0 }
 0x3a8   : > { %p1938_p3 = por %p1937_p8, %p1936_p11 }
 0x3aa   : > { %p1939_p10 = pnand %p1938_p3, %p1932_p2 }
 0x3ac   : > { %1942 = shalt.err (!%p1939_p10)
}
 0x3ad   : > { %s1943_s28 = scalar_lea.hbm %s2519_s10, 256  ;;  %s1947_s4 = scalar_lea.hbm %s2627_s3, 512 }
 0x3ae   : > { %p1944_p1 = scmp.ne.s32.totalorder %s2519_s10, %s1943_s28  ;;  %p1948_p7 = scmp.lt.s32.totalorder %s2519_s10, %s2627_s3 }
 0x3af   : > { %p1949_p9 = scmp.lt.s32.totalorder %s1947_s4, %s1943_s28 }
 0x3b0   : > { %p1945_p5 = pnand %p1944_p1, %p2261_p4 }
 0x3b1   : > { %p1950_p12 = por %p1949_p9, %p1948_p7 }
 0x3b2   : > { %p1946_p6 = pneg %p1945_p5 }
 0x3b4   : > { %p1951_p13 = pnand %p1950_p12, %p1946_p6 }
 0x3b6   : > { %1954 = shalt.err (!%p1951_p13)
}
 0x3b7   : > { %1528 = dma.vmem_to_hbm [thread:$0]  (%p2261_p4), %s2513_s17, 256, %s2519_s10, %s1074_s1, %s2055_s24, %s2055_s24, %s2050_s6  }
 0x3b8 PF: > { %s1147_s15 = sand.u32 1, %s2009_s21   ;;  %p2628_p0 = scmp.ne.s32.totalorder %s2616_s12, 0 }
 0x3b9   : > { %p2629_p2 = scmp.ge.s32.totalorder %s2029_s26, 2  ;;  %s1148_s14 = scalar_lea.sflag [#allocation7], %s1147_s15 }
 0x3bb   : > { %p1561_p11 = pnand %p2629_p2, %p2628_p0 }
 0x3bd   : > { %p1562_p8 = pneg %p1561_p11 }
 0x3bf   : > { %2000 = dma.done.wait (%p1562_p8), %s1148_s14, 256  }
 0x3c0   : > { %2002 = vsyncadd (%p1562_p8), %s1148_s14, 4294967040  ;;  %s2630_s29 = sadd.s32 4294967294, %s2029_s26  }
 0x3c1   : > { %s1156_s30 = sand.u32 1, %s2630_s29  }
 0x3c2   : > { %s1157_s27 = scalar_lea.sflag [#allocation21], %s1156_s30 }
 0x3c3   : > { %2004 = dma.done.wait (%p1562_p8), %s1157_s27, 512  }
 0x3c4   : > { %2006 = vsyncadd (%p1562_p8), %s1157_s27, 4294966784  ;;  %s36_s26 = sadd.s32 1, %s2029_s26   ;;  %s2631_s21 = smov %s2013_s22 }
 0x3c5   : > { %p33_p4 = scmp.ge.s32.totalorder %s36_s26, 4   ;;  %s2632_s22 = smov %s2017_s23 }
 0x3c6   : > { %s2633_s23 = smov %s2267_s20  ;;  %s2634_s24 = smov %s2025_s25 }
 0x3c7   : > { %s2635_s25 = smov %s2637_s13  ;;  %35 = sbr.rel (!%p33_p4) target bundleno = 22 (0x16), region = 191 }
 0x3cc   :  { %1171 = vsyncpa [#allocation6], 1 }
 0x3cd   :  { %1173 = vsyncpa [#allocation6 + $0x1], 1 }
 0x3ce   :  { %1174 = vsyncpa [#allocation9], 1 }
 0x3cf   :  { %1175 = vsyncpa [#allocation12], 1 }
 0x3d0   :  { %1176 = vsyncpa [#allocation15], 1 }
 0x3d1   :  { %1177 = vsyncpa [#allocation18], 1 }
 0x3d2   :  { %1178 = vsyncpa [#allocation7], 1 }
 0x3d3   :  { %1180 = vsyncpa [#allocation7 + $0x1], 1 }
 0x3d4   :  { %1181 = vsyncpa [#allocation21], 1 }
 0x3d5   :  { %1183 = vsyncpa [#allocation21 + $0x1], 1 }

</bundles_post_ra>
